<compile_context>
chip_gen: v7x
topology: tpu7x:2x2x1
jax: 0.10.0
libtpu: 0.0.40
codegen_flags: <defaults>
</compile_context>

<pallas_src>
import jax
import jax.numpy as jnp
from jax.experimental import pallas as pl
from jax.experimental.pallas import tpu as pltpu


def merge_attention_kernel(x_ref,
                           qwa_ref, qwm_ref, qb_ref,
                           kwa_ref, kwm_ref, kb_ref,
                           vwa_ref, vwm_ref, vb_ref,
                           ww_ref, bw_ref, wbias_ref, bbias_ref,
                           y_ref, weight_ref, bias_ref):
    C, L = x_ref.shape[1], x_ref.shape[2]
    h, _, d = qwm_ref.shape                       # (h, d, d)
    oc = ww_ref.shape[2]
    kk = L // d

    x = x_ref[0]                                  # (C, L): single lane-dense feature read

    # ---- adaptive_max_pool1d over contiguous chunks of length kk ----
    # TODO(synk): swap for x.reshape(C, d, kk).max(-1) once minor-dim-splitting reshapes
    # are uniformly supported by Mosaic on all target generations.
    mx = jnp.concatenate(
        [jnp.max(x[:, i * kk:(i + 1) * kk], axis=-1, keepdims=True) for i in range(d)],
        axis=-1)                                  # (C, d)
    # adaptive_avg_pool1d is folded into the *_avg weights in glue -> (C, L) @ (L, d) below.

    w_acc = jnp.zeros((C, oc), jnp.float32)
    b_acc = jnp.zeros((C, oc), jnp.float32)
    for hi in range(h):                           # h static & small -> unrolled; no lane slices
        q = (jnp.dot(x, qwa_ref[hi], preferred_element_type=jnp.float32)
             + jnp.dot(mx, qwm_ref[hi], preferred_element_type=jnp.float32) + qb_ref[hi])
        k = (jnp.dot(x, kwa_ref[hi], preferred_element_type=jnp.float32)
             + jnp.dot(mx, kwm_ref[hi], preferred_element_type=jnp.float32) + kb_ref[hi])
        v = (jnp.dot(x, vwa_ref[hi], preferred_element_type=jnp.float32)
             + jnp.dot(mx, vwm_ref[hi], preferred_element_type=jnp.float32) + vb_ref[hi])

        # attention over the C channel tokens (C**-0.5 already folded into the q path);
        # nn.Dropout(0.2) is identity at inference time.
        sc = jnp.einsum('cd,ed->ce', q, k, preferred_element_type=jnp.float32)   # (C, C)
        sc = sc - jnp.max(sc, axis=-1, keepdims=True)
        p = jnp.exp(sc)
        # exact reciprocal; approx=True would move this to the EUP slot but is kept exact
        # to preserve 1e-4 parity with the reference.
        p = p * pl.reciprocal(jnp.sum(p, axis=-1, keepdims=True), approx=False)
        head = jnp.dot(p, v, preferred_element_type=jnp.float32)                 # (C, d)

        w_acc = w_acc + jnp.dot(head, ww_ref[hi], preferred_element_type=jnp.float32)
        b_acc = b_acc + jnp.dot(head, bw_ref[hi], preferred_element_type=jnp.float32)

    weight = w_acc + wbias_ref[...]                          # (C, oc)
    bias_full = b_acc + bbias_ref[...]                       # (C, oc)
    bias_row = jnp.mean(bias_full, axis=0, keepdims=True)    # (1, oc)

    weight_ref[0] = weight.astype(weight_ref.dtype)
    bias_ref[0] = bias_row.astype(bias_ref.dtype)

    # ---- lane-dense per-pixel linear: y[o, l] = sum_c weight[c, o] * x[c, l] + bias[o] ----
    y = jnp.einsum('co,cl->ol', weight, x, preferred_element_type=jnp.float32)   # (oc, L)
    ones_c = jnp.ones((C, 1), jnp.float32)
    bias_col = jnp.einsum('co,cx->ox', bias_full, ones_c,
                          preferred_element_type=jnp.float32) * (1.0 / C)        # (oc, 1)
    y_ref[0] = (y + bias_col).astype(y_ref.dtype)


def merge_attention(features, params, *, out_channel, out_size, dim, head):
    """features: (B, C, H, W) float32 NCHW. Returns (y NCHW, weight (B,C,oc), bias (B,1,oc))."""
    B, C, Hin, Win = features.shape
    s, d, h, oc = out_size, dim, head, out_channel
    L = s * s
    assert L % d == 0, "fast path assumes s*s divisible by dim"
    # TODO(synk): general adaptive_{avg,max}_pool1d variable-length bins for L % dim != 0.
    kk = L // d

    # F.interpolate(features, s) default mode='nearest': src index = floor(i * Hin / s)
    ih = (jnp.arange(s) * Hin) // s
    iw = (jnp.arange(s) * Win) // s
    f = features[:, :, ih, :][:, :, :, iw]                   # (B, C, s, s)
    x = f.reshape(B, C, L)                                   # (B, C, L) - metadata-only reshape

    qkv_w, qkv_b, wb_w, wb_b = params                        # (2d,3hd),(3hd,),(hd,2oc),(2oc,)
    scale = C ** (-0.5)

    # PyTorch: qkv(data).reshape(b,c,h,d,3) -> q/k/v interleave with stride 3 along cols.
    qw, kw, vw = qkv_w[:, 0::3], qkv_w[:, 1::3], qkv_w[:, 2::3]      # (2d, h*d)
    qb, kb, vb = qkv_b[0::3], qkv_b[1::3], qkv_b[2::3]               # (h*d,)
    # PyTorch: wb(v).reshape(b,c,oc,2) -> weight/bias interleave with stride 2 along cols.
    ww, bw = wb_w[:, 0::2], wb_w[:, 1::2]                            # (h*d, oc)
    wbias, bbias = wb_b[0::2][None, :], wb_b[1::2][None, :]          # (1, oc)

    # Constant avg-pooling matrix P (L, d); folded into the avg-path weights below.
    P = (jnp.arange(L)[:, None] // kk == jnp.arange(d)[None, :]).astype(jnp.float32) / kk

    def split_qkv(w2, bvec, fold_scale):
        wa, wm = w2[:d], w2[d:]                                           # avg rows / max rows
        wa_h = jnp.stack([wa[:, i * d:(i + 1) * d] for i in range(h)])    # (h, d, d)
        wm_h = jnp.stack([wm[:, i * d:(i + 1) * d] for i in range(h)])    # (h, d, d)
        b_h = jnp.stack([bvec[i * d:(i + 1) * d][None, :] for i in range(h)])  # (h, 1, d)
        wa_full = jnp.einsum('li,hij->hlj', P, wa_h)                      # (h, L, d) avg pool folded
        if fold_scale:                                                    # fold C**-0.5 into q path
            wa_full, wm_h, b_h = wa_full * scale, wm_h * scale, b_h * scale
        return wa_full, wm_h, b_h

    qwa, qwm, qbh = split_qkv(qw, qb, True)
    kwa, kwm, kbh = split_qkv(kw, kb, False)
    vwa, vwm, vbh = split_qkv(vw, vb, False)
    wwh = jnp.stack([ww[i * d:(i + 1) * d] for i in range(h)])            # (h, d, oc)
    bwh = jnp.stack([bw[i * d:(i + 1) * d] for i in range(h)])            # (h, d, oc)

    def const_spec(a):
        n = a.ndim
        return pl.BlockSpec(a.shape, lambda b, n=n: (0,) * n)

    grid_spec = pltpu.PrefetchScalarGridSpec(
        num_scalar_prefetch=0,
        grid=(B,),
        in_specs=[
            pl.BlockSpec((1, C, L), lambda b: (b, 0, 0)),
            const_spec(qwa), const_spec(qwm), const_spec(qbh),
            const_spec(kwa), const_spec(kwm), const_spec(kbh),
            const_spec(vwa), const_spec(vwm), const_spec(vbh),
            const_spec(wwh), const_spec(bwh), const_spec(wbias), const_spec(bbias),
        ],
        out_specs=[
            pl.BlockSpec((1, oc, L), lambda b: (b, 0, 0)),
            pl.BlockSpec((1, C, oc), lambda b: (b, 0, 0)),
            pl.BlockSpec((1, 1, oc), lambda b: (b, 0, 0)),
        ],
    )

    # TODO(synk): at large out_size on v7x (64 MiB VMEM) add a second grid axis tiling L with
    # the attention prologue under pl.when(lt == 0) into VMEM scratch; at large B, process
    # several batches per grid step (and optionally cast the per-pixel matmul to bf16).
    y_ocl, weight, bias = pl.pallas_call(
        merge_attention_kernel,
        out_shape=(
            jax.ShapeDtypeStruct((B, oc, L), jnp.float32),
            jax.ShapeDtypeStruct((B, C, oc), jnp.float32),
            jax.ShapeDtypeStruct((B, 1, oc), jnp.float32),
        ),
        grid_spec=grid_spec,
        compiler_params=pltpu.CompilerParams(dimension_semantics=("parallel",)),
    )(x, qwa, qwm, qbh, kwa, kwm, kbh, vwa, vwm, vbh, wwh, bwh, wbias, bbias)

    y = y_ocl.reshape(B, oc, s, s)                  # already NCHW: no output transpose pass
    return y, weight, bias


def merge_attention_reference(features, params, *, out_channel, out_size, dim, head):
    """Pure-JAX reproduction of the PyTorch forward (eval mode)."""
    B, C, Hin, Win = features.shape
    s, d, h, oc = out_size, dim, head, out_channel
    qkv_w, qkv_b, wb_w, wb_b = params

    ih = (jnp.arange(s) * Hin) // s
    iw = (jnp.arange(s) * Win) // s
    f = features[:, :, ih, :][:, :, :, iw]
    L = s * s
    f1d = f.reshape(B, C, L)
    kk = L // d
    avg = f1d.reshape(B, C, d, kk).mean(-1)
    mx = f1d.reshape(B, C, d, kk).max(-1)
    data = jnp.concatenate([avg, mx], -1)

    qkv = (data @ qkv_w + qkv_b).reshape(B, C, h, d, 3).transpose(0, 2, 1, 3, 4)
    q, k, v = qkv[..., 0], qkv[..., 1], qkv[..., 2]
    scale = C ** (-0.5)
    attn = jnp.einsum('bhcd,bhed->bhce', q, k) * scale
    attn = jax.nn.softmax(attn, axis=-1)
    v = jnp.einsum('bhce,bhed->bhcd', attn, v)
    v = v.transpose(0, 2, 1, 3).reshape(B, C, h * d)
    wb = (v @ wb_w + wb_b).reshape(B, C, oc, 2)
    weight, bias = wb[..., 0], wb[..., 1]
    bias = bias.mean(axis=1, keepdims=True)

    x = f.transpose(0, 3, 2, 1)                       # torch transpose(1, -1)
    y = jnp.einsum('bwhc,bco->bwho', x, weight) + bias[:, :, None, :]
    y = y.transpose(0, 3, 2, 1)
    return y, weight, bias


if __name__ == "__main__":
    out_channel, out_size, dim, head = 8, 8, 16, 2
    B, Cin, Hin, Win = 2, 4, 16, 16

    key = jax.random.PRNGKey(0)
    k1, k2, k3, k4, k5 = jax.random.split(key, 5)
    lim1 = 1.0 / float(jnp.sqrt(2 * dim))
    qkv_w = jax.random.uniform(k1, (2 * dim, 3 * head * dim), jnp.float32, -lim1, lim1)
    qkv_b = jax.random.uniform(k2, (3 * head * dim,), jnp.float32, -lim1, lim1)
    lim2 = 1.0 / float(jnp.sqrt(head * dim))
    wb_w = jax.random.uniform(k3, (head * dim, 2 * out_channel), jnp.float32, -lim2, lim2)
    wb_b = jax.random.uniform(k4, (2 * out_channel,), jnp.float32, -lim2, lim2)
    params = (qkv_w, qkv_b, wb_w, wb_b)

    x = jax.random.normal(k5, (B, Cin, Hin, Win), jnp.float32)

    y, w, b = merge_attention(x, params, out_channel=out_channel,
                              out_size=out_size, dim=dim, head=head)
    jax.block_until_ready((y, w, b))

    y_ref, w_ref, b_ref = merge_attention_reference(
        x, params, out_channel=out_channel, out_size=out_size, dim=dim, head=head)

    assert y.shape == (B, out_channel, out_size, out_size)
    assert w.shape == (B, Cin, out_channel)
    assert b.shape == (B, 1, out_channel)
    assert jnp.allclose(y, y_ref, atol=1e-4, rtol=1e-4)
    assert jnp.allclose(w, w_ref, atol=1e-4, rtol=1e-4)
    assert jnp.allclose(b, b_ref, atol=1e-4, rtol=1e-4)

    print("KERNEL_OK")
</pallas_src>

<mosaic_0001>
module attributes {stable_mosaic.version = 11 : i64} {
  func.func @merge_attention_kernel(%arg0: i32, %arg1: memref<1x4x64xf32, #tpu.memory_space<vmem>>, %arg2: memref<2x64x16xf32, #tpu.memory_space<vmem>>, %arg3: memref<2x16x16xf32, #tpu.memory_space<vmem>>, %arg4: memref<2x1x16xf32, #tpu.memory_space<vmem>>, %arg5: memref<2x64x16xf32, #tpu.memory_space<vmem>>, %arg6: memref<2x16x16xf32, #tpu.memory_space<vmem>>, %arg7: memref<2x1x16xf32, #tpu.memory_space<vmem>>, %arg8: memref<2x64x16xf32, #tpu.memory_space<vmem>>, %arg9: memref<2x16x16xf32, #tpu.memory_space<vmem>>, %arg10: memref<2x1x16xf32, #tpu.memory_space<vmem>>, %arg11: memref<2x16x8xf32, #tpu.memory_space<vmem>>, %arg12: memref<2x16x8xf32, #tpu.memory_space<vmem>>, %arg13: memref<1x8xf32, #tpu.memory_space<vmem>>, %arg14: memref<1x8xf32, #tpu.memory_space<vmem>>, %arg15: memref<1x8x64xf32, #tpu.memory_space<vmem>>, %arg16: memref<1x4x8xf32, #tpu.memory_space<vmem>>, %arg17: memref<1x1x8xf32, #tpu.memory_space<vmem>>) attributes {dimension_semantics = [#tpu.dimension_semantics<parallel>], iteration_bounds = array<i64: 2>, scalar_prefetch = 0 : i64, scratch_operands = 0 : i64, tpu.core_type = #tpu.core_type<tc>, window_params = [{transform_indices = @transform_0, window_bounds = array<i64: 1, 4, 64>}, {pipeline_mode = #tpu.pipeline_mode<synchronous>, transform_indices = @transform_1, window_bounds = array<i64: 2, 64, 16>}, {pipeline_mode = #tpu.pipeline_mode<synchronous>, transform_indices = @transform_2, window_bounds = array<i64: 2, 16, 16>}, {pipeline_mode = #tpu.pipeline_mode<synchronous>, transform_indices = @transform_3, window_bounds = array<i64: 2, 1, 16>}, {pipeline_mode = #tpu.pipeline_mode<synchronous>, transform_indices = @transform_4, window_bounds = array<i64: 2, 64, 16>}, {pipeline_mode = #tpu.pipeline_mode<synchronous>, transform_indices = @transform_5, window_bounds = array<i64: 2, 16, 16>}, {pipeline_mode = #tpu.pipeline_mode<synchronous>, transform_indices = @transform_6, window_bounds = array<i64: 2, 1, 16>}, {pipeline_mode = #tpu.pipeline_mode<synchronous>, transform_indices = @transform_7, window_bounds = array<i64: 2, 64, 16>}, {pipeline_mode = #tpu.pipeline_mode<synchronous>, transform_indices = @transform_8, window_bounds = array<i64: 2, 16, 16>}, {pipeline_mode = #tpu.pipeline_mode<synchronous>, transform_indices = @transform_9, window_bounds = array<i64: 2, 1, 16>}, {pipeline_mode = #tpu.pipeline_mode<synchronous>, transform_indices = @transform_10, window_bounds = array<i64: 2, 16, 8>}, {pipeline_mode = #tpu.pipeline_mode<synchronous>, transform_indices = @transform_11, window_bounds = array<i64: 2, 16, 8>}, {pipeline_mode = #tpu.pipeline_mode<synchronous>, transform_indices = @transform_12, window_bounds = array<i64: 1, 8>}, {pipeline_mode = #tpu.pipeline_mode<synchronous>, transform_indices = @transform_13, window_bounds = array<i64: 1, 8>}, {transform_indices = @transform_14, window_bounds = array<i64: 1, 8, 64>}, {transform_indices = @transform_15, window_bounds = array<i64: 1, 4, 8>}, {transform_indices = @transform_16, window_bounds = array<i64: 1, 1, 8>}]} {
    %c0 = arith.constant 0 : index
    %c0_0 = arith.constant 0 : index
    %c0_1 = arith.constant 0 : index
    %0 = vector.load %arg1[%c0, %c0_0, %c0_1] : memref<1x4x64xf32, #tpu.memory_space<vmem>>, vector<1x4x64xf32>
    %1 = vector.shape_cast %0 : vector<1x4x64xf32> to vector<4x64xf32>
    %2 = vector.extract_strided_slice %1 {offsets = [0, 0], sizes = [4, 4], strides = [1, 1]} : vector<4x64xf32> to vector<4x4xf32>
    %cst = arith.constant dense<0xFF800000> : vector<4xf32>
    %3 = vector.multi_reduction <maximumf>, %2, %cst [1] : vector<4x4xf32> to vector<4xf32>
    %4 = vector.shape_cast %3 : vector<4xf32> to vector<4x1xf32>
    %5 = vector.extract_strided_slice %1 {offsets = [0, 4], sizes = [4, 4], strides = [1, 1]} : vector<4x64xf32> to vector<4x4xf32>
    %cst_2 = arith.constant dense<0xFF800000> : vector<4xf32>
    %6 = vector.multi_reduction <maximumf>, %5, %cst_2 [1] : vector<4x4xf32> to vector<4xf32>
    %7 = vector.shape_cast %6 : vector<4xf32> to vector<4x1xf32>
    %8 = vector.extract_strided_slice %1 {offsets = [0, 8], sizes = [4, 4], strides = [1, 1]} : vector<4x64xf32> to vector<4x4xf32>
    %cst_3 = arith.constant dense<0xFF800000> : vector<4xf32>
    %9 = vector.multi_reduction <maximumf>, %8, %cst_3 [1] : vector<4x4xf32> to vector<4xf32>
    %10 = vector.shape_cast %9 : vector<4xf32> to vector<4x1xf32>
    %11 = vector.extract_strided_slice %1 {offsets = [0, 12], sizes = [4, 4], strides = [1, 1]} : vector<4x64xf32> to vector<4x4xf32>
    %cst_4 = arith.constant dense<0xFF800000> : vector<4xf32>
    %12 = vector.multi_reduction <maximumf>, %11, %cst_4 [1] : vector<4x4xf32> to vector<4xf32>
    %13 = vector.shape_cast %12 : vector<4xf32> to vector<4x1xf32>
    %14 = vector.extract_strided_slice %1 {offsets = [0, 16], sizes = [4, 4], strides = [1, 1]} : vector<4x64xf32> to vector<4x4xf32>
    %cst_5 = arith.constant dense<0xFF800000> : vector<4xf32>
    %15 = vector.multi_reduction <maximumf>, %14, %cst_5 [1] : vector<4x4xf32> to vector<4xf32>
    %16 = vector.shape_cast %15 : vector<4xf32> to vector<4x1xf32>
    %17 = vector.extract_strided_slice %1 {offsets = [0, 20], sizes = [4, 4], strides = [1, 1]} : vector<4x64xf32> to vector<4x4xf32>
    %cst_6 = arith.constant dense<0xFF800000> : vector<4xf32>
    %18 = vector.multi_reduction <maximumf>, %17, %cst_6 [1] : vector<4x4xf32> to vector<4xf32>
    %19 = vector.shape_cast %18 : vector<4xf32> to vector<4x1xf32>
    %20 = vector.extract_strided_slice %1 {offsets = [0, 24], sizes = [4, 4], strides = [1, 1]} : vector<4x64xf32> to vector<4x4xf32>
    %cst_7 = arith.constant dense<0xFF800000> : vector<4xf32>
    %21 = vector.multi_reduction <maximumf>, %20, %cst_7 [1] : vector<4x4xf32> to vector<4xf32>
    %22 = vector.shape_cast %21 : vector<4xf32> to vector<4x1xf32>
    %23 = vector.extract_strided_slice %1 {offsets = [0, 28], sizes = [4, 4], strides = [1, 1]} : vector<4x64xf32> to vector<4x4xf32>
    %cst_8 = arith.constant dense<0xFF800000> : vector<4xf32>
    %24 = vector.multi_reduction <maximumf>, %23, %cst_8 [1] : vector<4x4xf32> to vector<4xf32>
    %25 = vector.shape_cast %24 : vector<4xf32> to vector<4x1xf32>
    %26 = vector.extract_strided_slice %1 {offsets = [0, 32], sizes = [4, 4], strides = [1, 1]} : vector<4x64xf32> to vector<4x4xf32>
    %cst_9 = arith.constant dense<0xFF800000> : vector<4xf32>
    %27 = vector.multi_reduction <maximumf>, %26, %cst_9 [1] : vector<4x4xf32> to vector<4xf32>
    %28 = vector.shape_cast %27 : vector<4xf32> to vector<4x1xf32>
    %29 = vector.extract_strided_slice %1 {offsets = [0, 36], sizes = [4, 4], strides = [1, 1]} : vector<4x64xf32> to vector<4x4xf32>
    %cst_10 = arith.constant dense<0xFF800000> : vector<4xf32>
    %30 = vector.multi_reduction <maximumf>, %29, %cst_10 [1] : vector<4x4xf32> to vector<4xf32>
    %31 = vector.shape_cast %30 : vector<4xf32> to vector<4x1xf32>
    %32 = vector.extract_strided_slice %1 {offsets = [0, 40], sizes = [4, 4], strides = [1, 1]} : vector<4x64xf32> to vector<4x4xf32>
    %cst_11 = arith.constant dense<0xFF800000> : vector<4xf32>
    %33 = vector.multi_reduction <maximumf>, %32, %cst_11 [1] : vector<4x4xf32> to vector<4xf32>
    %34 = vector.shape_cast %33 : vector<4xf32> to vector<4x1xf32>
    %35 = vector.extract_strided_slice %1 {offsets = [0, 44], sizes = [4, 4], strides = [1, 1]} : vector<4x64xf32> to vector<4x4xf32>
    %cst_12 = arith.constant dense<0xFF800000> : vector<4xf32>
    %36 = vector.multi_reduction <maximumf>, %35, %cst_12 [1] : vector<4x4xf32> to vector<4xf32>
    %37 = vector.shape_cast %36 : vector<4xf32> to vector<4x1xf32>
    %38 = vector.extract_strided_slice %1 {offsets = [0, 48], sizes = [4, 4], strides = [1, 1]} : vector<4x64xf32> to vector<4x4xf32>
    %cst_13 = arith.constant dense<0xFF800000> : vector<4xf32>
    %39 = vector.multi_reduction <maximumf>, %38, %cst_13 [1] : vector<4x4xf32> to vector<4xf32>
    %40 = vector.shape_cast %39 : vector<4xf32> to vector<4x1xf32>
    %41 = vector.extract_strided_slice %1 {offsets = [0, 52], sizes = [4, 4], strides = [1, 1]} : vector<4x64xf32> to vector<4x4xf32>
    %cst_14 = arith.constant dense<0xFF800000> : vector<4xf32>
    %42 = vector.multi_reduction <maximumf>, %41, %cst_14 [1] : vector<4x4xf32> to vector<4xf32>
    %43 = vector.shape_cast %42 : vector<4xf32> to vector<4x1xf32>
    %44 = vector.extract_strided_slice %1 {offsets = [0, 56], sizes = [4, 4], strides = [1, 1]} : vector<4x64xf32> to vector<4x4xf32>
    %cst_15 = arith.constant dense<0xFF800000> : vector<4xf32>
    %45 = vector.multi_reduction <maximumf>, %44, %cst_15 [1] : vector<4x4xf32> to vector<4xf32>
    %46 = vector.shape_cast %45 : vector<4xf32> to vector<4x1xf32>
    %47 = vector.extract_strided_slice %1 {offsets = [0, 60], sizes = [4, 4], strides = [1, 1]} : vector<4x64xf32> to vector<4x4xf32>
    %cst_16 = arith.constant dense<0xFF800000> : vector<4xf32>
    %48 = vector.multi_reduction <maximumf>, %47, %cst_16 [1] : vector<4x4xf32> to vector<4xf32>
    %49 = vector.shape_cast %48 : vector<4xf32> to vector<4x1xf32>
    %50 = tpu.concatenate %4, %7, %10, %13, %16, %19, %22, %25, %28, %31, %34, %37, %40, %43, %46, %49 in 1 : vector<4x1xf32>, vector<4x1xf32>, vector<4x1xf32>, vector<4x1xf32>, vector<4x1xf32>, vector<4x1xf32>, vector<4x1xf32>, vector<4x1xf32>, vector<4x1xf32>, vector<4x1xf32>, vector<4x1xf32>, vector<4x1xf32>, vector<4x1xf32>, vector<4x1xf32>, vector<4x1xf32>, vector<4x1xf32> -> vector<4x16xf32>
    %cst_17 = arith.constant 0.000000e+00 : f32
    %51 = vector.broadcast %cst_17 : f32 to vector<4x8xf32>
    %cst_18 = arith.constant 0.000000e+00 : f32
    %52 = vector.broadcast %cst_18 : f32 to vector<4x8xf32>
    %c0_19 = arith.constant 0 : index
    %c0_20 = arith.constant 0 : index
    %c0_21 = arith.constant 0 : index
    %53 = vector.load %arg2[%c0_19, %c0_20, %c0_21] : memref<2x64x16xf32, #tpu.memory_space<vmem>>, vector<1x64x16xf32>
    %54 = vector.shape_cast %53 : vector<1x64x16xf32> to vector<64x16xf32>
    %cst_22 = arith.constant dense<0.000000e+00> : vector<4x16xf32>
    %55 = tpu.matmul %1, %54, %cst_22 {dimension_numbers = #tpu.dot_dimension_numbers<[1], [0], [0], [1], [0, 0, 1, 1], [], []>} : vector<4x64xf32>, vector<64x16xf32>, vector<4x16xf32> -> vector<4x16xf32>
    %c0_23 = arith.constant 0 : index
    %c0_24 = arith.constant 0 : index
    %c0_25 = arith.constant 0 : index
    %56 = vector.load %arg3[%c0_23, %c0_24, %c0_25] : memref<2x16x16xf32, #tpu.memory_space<vmem>>, vector<1x16x16xf32>
    %57 = vector.shape_cast %56 : vector<1x16x16xf32> to vector<16x16xf32>
    %cst_26 = arith.constant dense<0.000000e+00> : vector<4x16xf32>
    %58 = tpu.matmul %50, %57, %cst_26 {dimension_numbers = #tpu.dot_dimension_numbers<[1], [0], [0], [1], [0, 0, 1, 1], [], []>} : vector<4x16xf32>, vector<16x16xf32>, vector<4x16xf32> -> vector<4x16xf32>
    %59 = arith.addf %55, %58 : vector<4x16xf32>
    %c0_27 = arith.constant 0 : index
    %c0_28 = arith.constant 0 : index
    %c0_29 = arith.constant 0 : index
    %60 = vector.load %arg4[%c0_27, %c0_28, %c0_29] : memref<2x1x16xf32, #tpu.memory_space<vmem>>, vector<1x1x16xf32>
    %61 = vector.shape_cast %60 : vector<1x1x16xf32> to vector<1x16xf32>
    %62 = vector.broadcast %61 : vector<1x16xf32> to vector<4x16xf32>
    %63 = arith.addf %59, %62 : vector<4x16xf32>
    %c0_30 = arith.constant 0 : index
    %c0_31 = arith.constant 0 : index
    %c0_32 = arith.constant 0 : index
    %64 = vector.load %arg5[%c0_30, %c0_31, %c0_32] : memref<2x64x16xf32, #tpu.memory_space<vmem>>, vector<1x64x16xf32>
    %65 = vector.shape_cast %64 : vector<1x64x16xf32> to vector<64x16xf32>
    %cst_33 = arith.constant dense<0.000000e+00> : vector<4x16xf32>
    %66 = tpu.matmul %1, %65, %cst_33 {dimension_numbers = #tpu.dot_dimension_numbers<[1], [0], [0], [1], [0, 0, 1, 1], [], []>} : vector<4x64xf32>, vector<64x16xf32>, vector<4x16xf32> -> vector<4x16xf32>
    %c0_34 = arith.constant 0 : index
    %c0_35 = arith.constant 0 : index
    %c0_36 = arith.constant 0 : index
    %67 = vector.load %arg6[%c0_34, %c0_35, %c0_36] : memref<2x16x16xf32, #tpu.memory_space<vmem>>, vector<1x16x16xf32>
    %68 = vector.shape_cast %67 : vector<1x16x16xf32> to vector<16x16xf32>
    %cst_37 = arith.constant dense<0.000000e+00> : vector<4x16xf32>
    %69 = tpu.matmul %50, %68, %cst_37 {dimension_numbers = #tpu.dot_dimension_numbers<[1], [0], [0], [1], [0, 0, 1, 1], [], []>} : vector<4x16xf32>, vector<16x16xf32>, vector<4x16xf32> -> vector<4x16xf32>
    %70 = arith.addf %66, %69 : vector<4x16xf32>
    %c0_38 = arith.constant 0 : index
    %c0_39 = arith.constant 0 : index
    %c0_40 = arith.constant 0 : index
    %71 = vector.load %arg7[%c0_38, %c0_39, %c0_40] : memref<2x1x16xf32, #tpu.memory_space<vmem>>, vector<1x1x16xf32>
    %72 = vector.shape_cast %71 : vector<1x1x16xf32> to vector<1x16xf32>
    %73 = vector.broadcast %72 : vector<1x16xf32> to vector<4x16xf32>
    %74 = arith.addf %70, %73 : vector<4x16xf32>
    %c0_41 = arith.constant 0 : index
    %c0_42 = arith.constant 0 : index
    %c0_43 = arith.constant 0 : index
    %75 = vector.load %arg8[%c0_41, %c0_42, %c0_43] : memref<2x64x16xf32, #tpu.memory_space<vmem>>, vector<1x64x16xf32>
    %76 = vector.shape_cast %75 : vector<1x64x16xf32> to vector<64x16xf32>
    %cst_44 = arith.constant dense<0.000000e+00> : vector<4x16xf32>
    %77 = tpu.matmul %1, %76, %cst_44 {dimension_numbers = #tpu.dot_dimension_numbers<[1], [0], [0], [1], [0, 0, 1, 1], [], []>} : vector<4x64xf32>, vector<64x16xf32>, vector<4x16xf32> -> vector<4x16xf32>
    %c0_45 = arith.constant 0 : index
    %c0_46 = arith.constant 0 : index
    %c0_47 = arith.constant 0 : index
    %78 = vector.load %arg9[%c0_45, %c0_46, %c0_47] : memref<2x16x16xf32, #tpu.memory_space<vmem>>, vector<1x16x16xf32>
    %79 = vector.shape_cast %78 : vector<1x16x16xf32> to vector<16x16xf32>
    %cst_48 = arith.constant dense<0.000000e+00> : vector<4x16xf32>
    %80 = tpu.matmul %50, %79, %cst_48 {dimension_numbers = #tpu.dot_dimension_numbers<[1], [0], [0], [1], [0, 0, 1, 1], [], []>} : vector<4x16xf32>, vector<16x16xf32>, vector<4x16xf32> -> vector<4x16xf32>
    %81 = arith.addf %77, %80 : vector<4x16xf32>
    %c0_49 = arith.constant 0 : index
    %c0_50 = arith.constant 0 : index
    %c0_51 = arith.constant 0 : index
    %82 = vector.load %arg10[%c0_49, %c0_50, %c0_51] : memref<2x1x16xf32, #tpu.memory_space<vmem>>, vector<1x1x16xf32>
    %83 = vector.shape_cast %82 : vector<1x1x16xf32> to vector<1x16xf32>
    %84 = vector.broadcast %83 : vector<1x16xf32> to vector<4x16xf32>
    %85 = arith.addf %81, %84 : vector<4x16xf32>
    "tpu.trace_start"() <{level = 10 : i32, message = "cd,ed->ce"}> : () -> ()
    %cst_52 = arith.constant dense<0.000000e+00> : vector<4x4xf32>
    %86 = tpu.matmul %63, %74, %cst_52 {dimension_numbers = #tpu.dot_dimension_numbers<[1], [1], [0], [0], [0, 0, 1, 0], [], []>} : vector<4x16xf32>, vector<4x16xf32>, vector<4x4xf32> -> vector<4x4xf32>
    "tpu.trace_stop"() : () -> ()
    %cst_53 = arith.constant dense<0xFF800000> : vector<4xf32>
    %87 = vector.multi_reduction <maximumf>, %86, %cst_53 [1] : vector<4x4xf32> to vector<4xf32>
    %88 = vector.shape_cast %87 : vector<4xf32> to vector<4x1xf32>
    %89 = vector.broadcast %88 : vector<4x1xf32> to vector<4x4xf32>
    %90 = arith.subf %86, %89 : vector<4x4xf32>
    %91 = math.exp %90 : vector<4x4xf32>
    %cst_54 = arith.constant dense<0.000000e+00> : vector<4xf32>
    %92 = vector.multi_reduction <add>, %91, %cst_54 [1] : vector<4x4xf32> to vector<4xf32>
    %93 = vector.shape_cast %92 : vector<4xf32> to vector<4x1xf32>
    %94 = tpu.reciprocal %93 : vector<4x1xf32> -> vector<4x1xf32>
    %95 = vector.broadcast %94 : vector<4x1xf32> to vector<4x4xf32>
    %96 = arith.mulf %91, %95 : vector<4x4xf32>
    %cst_55 = arith.constant dense<0.000000e+00> : vector<4x16xf32>
    %97 = tpu.matmul %96, %85, %cst_55 {dimension_numbers = #tpu.dot_dimension_numbers<[1], [0], [0], [1], [0, 0, 1, 1], [], []>} : vector<4x4xf32>, vector<4x16xf32>, vector<4x16xf32> -> vector<4x16xf32>
    %c0_56 = arith.constant 0 : index
    %c0_57 = arith.constant 0 : index
    %c0_58 = arith.constant 0 : index
    %98 = vector.load %arg11[%c0_56, %c0_57, %c0_58] : memref<2x16x8xf32, #tpu.memory_space<vmem>>, vector<1x16x8xf32>
    %99 = vector.shape_cast %98 : vector<1x16x8xf32> to vector<16x8xf32>
    %cst_59 = arith.constant dense<0.000000e+00> : vector<4x8xf32>
    %100 = tpu.matmul %97, %99, %cst_59 {dimension_numbers = #tpu.dot_dimension_numbers<[1], [0], [0], [1], [0, 0, 1, 1], [], []>} : vector<4x16xf32>, vector<16x8xf32>, vector<4x8xf32> -> vector<4x8xf32>
    %101 = arith.addf %51, %100 : vector<4x8xf32>
    %c0_60 = arith.constant 0 : index
    %c0_61 = arith.constant 0 : index
    %c0_62 = arith.constant 0 : index
    %102 = vector.load %arg12[%c0_60, %c0_61, %c0_62] : memref<2x16x8xf32, #tpu.memory_space<vmem>>, vector<1x16x8xf32>
    %103 = vector.shape_cast %102 : vector<1x16x8xf32> to vector<16x8xf32>
    %cst_63 = arith.constant dense<0.000000e+00> : vector<4x8xf32>
    %104 = tpu.matmul %97, %103, %cst_63 {dimension_numbers = #tpu.dot_dimension_numbers<[1], [0], [0], [1], [0, 0, 1, 1], [], []>} : vector<4x16xf32>, vector<16x8xf32>, vector<4x8xf32> -> vector<4x8xf32>
    %105 = arith.addf %52, %104 : vector<4x8xf32>
    %c1 = arith.constant 1 : index
    %c0_64 = arith.constant 0 : index
    %c0_65 = arith.constant 0 : index
    %106 = vector.load %arg2[%c1, %c0_64, %c0_65] : memref<2x64x16xf32, #tpu.memory_space<vmem>>, vector<1x64x16xf32>
    %107 = vector.shape_cast %106 : vector<1x64x16xf32> to vector<64x16xf32>
    %cst_66 = arith.constant dense<0.000000e+00> : vector<4x16xf32>
    %108 = tpu.matmul %1, %107, %cst_66 {dimension_numbers = #tpu.dot_dimension_numbers<[1], [0], [0], [1], [0, 0, 1, 1], [], []>} : vector<4x64xf32>, vector<64x16xf32>, vector<4x16xf32> -> vector<4x16xf32>
    %c1_67 = arith.constant 1 : index
    %c0_68 = arith.constant 0 : index
    %c0_69 = arith.constant 0 : index
    %109 = vector.load %arg3[%c1_67, %c0_68, %c0_69] : memref<2x16x16xf32, #tpu.memory_space<vmem>>, vector<1x16x16xf32>
    %110 = vector.shape_cast %109 : vector<1x16x16xf32> to vector<16x16xf32>
    %cst_70 = arith.constant dense<0.000000e+00> : vector<4x16xf32>
    %111 = tpu.matmul %50, %110, %cst_70 {dimension_numbers = #tpu.dot_dimension_numbers<[1], [0], [0], [1], [0, 0, 1, 1], [], []>} : vector<4x16xf32>, vector<16x16xf32>, vector<4x16xf32> -> vector<4x16xf32>
    %112 = arith.addf %108, %111 : vector<4x16xf32>
    %c1_71 = arith.constant 1 : index
    %c0_72 = arith.constant 0 : index
    %c0_73 = arith.constant 0 : index
    %113 = vector.load %arg4[%c1_71, %c0_72, %c0_73] : memref<2x1x16xf32, #tpu.memory_space<vmem>>, vector<1x1x16xf32>
    %114 = vector.shape_cast %113 : vector<1x1x16xf32> to vector<1x16xf32>
    %115 = vector.broadcast %114 : vector<1x16xf32> to vector<4x16xf32>
    %116 = arith.addf %112, %115 : vector<4x16xf32>
    %c1_74 = arith.constant 1 : index
    %c0_75 = arith.constant 0 : index
    %c0_76 = arith.constant 0 : index
    %117 = vector.load %arg5[%c1_74, %c0_75, %c0_76] : memref<2x64x16xf32, #tpu.memory_space<vmem>>, vector<1x64x16xf32>
    %118 = vector.shape_cast %117 : vector<1x64x16xf32> to vector<64x16xf32>
    %cst_77 = arith.constant dense<0.000000e+00> : vector<4x16xf32>
    %119 = tpu.matmul %1, %118, %cst_77 {dimension_numbers = #tpu.dot_dimension_numbers<[1], [0], [0], [1], [0, 0, 1, 1], [], []>} : vector<4x64xf32>, vector<64x16xf32>, vector<4x16xf32> -> vector<4x16xf32>
    %c1_78 = arith.constant 1 : index
    %c0_79 = arith.constant 0 : index
    %c0_80 = arith.constant 0 : index
    %120 = vector.load %arg6[%c1_78, %c0_79, %c0_80] : memref<2x16x16xf32, #tpu.memory_space<vmem>>, vector<1x16x16xf32>
    %121 = vector.shape_cast %120 : vector<1x16x16xf32> to vector<16x16xf32>
    %cst_81 = arith.constant dense<0.000000e+00> : vector<4x16xf32>
    %122 = tpu.matmul %50, %121, %cst_81 {dimension_numbers = #tpu.dot_dimension_numbers<[1], [0], [0], [1], [0, 0, 1, 1], [], []>} : vector<4x16xf32>, vector<16x16xf32>, vector<4x16xf32> -> vector<4x16xf32>
    %123 = arith.addf %119, %122 : vector<4x16xf32>
    %c1_82 = arith.constant 1 : index
    %c0_83 = arith.constant 0 : index
    %c0_84 = arith.constant 0 : index
    %124 = vector.load %arg7[%c1_82, %c0_83, %c0_84] : memref<2x1x16xf32, #tpu.memory_space<vmem>>, vector<1x1x16xf32>
    %125 = vector.shape_cast %124 : vector<1x1x16xf32> to vector<1x16xf32>
    %126 = vector.broadcast %125 : vector<1x16xf32> to vector<4x16xf32>
    %127 = arith.addf %123, %126 : vector<4x16xf32>
    %c1_85 = arith.constant 1 : index
    %c0_86 = arith.constant 0 : index
    %c0_87 = arith.constant 0 : index
    %128 = vector.load %arg8[%c1_85, %c0_86, %c0_87] : memref<2x64x16xf32, #tpu.memory_space<vmem>>, vector<1x64x16xf32>
    %129 = vector.shape_cast %128 : vector<1x64x16xf32> to vector<64x16xf32>
    %cst_88 = arith.constant dense<0.000000e+00> : vector<4x16xf32>
    %130 = tpu.matmul %1, %129, %cst_88 {dimension_numbers = #tpu.dot_dimension_numbers<[1], [0], [0], [1], [0, 0, 1, 1], [], []>} : vector<4x64xf32>, vector<64x16xf32>, vector<4x16xf32> -> vector<4x16xf32>
    %c1_89 = arith.constant 1 : index
    %c0_90 = arith.constant 0 : index
    %c0_91 = arith.constant 0 : index
    %131 = vector.load %arg9[%c1_89, %c0_90, %c0_91] : memref<2x16x16xf32, #tpu.memory_space<vmem>>, vector<1x16x16xf32>
    %132 = vector.shape_cast %131 : vector<1x16x16xf32> to vector<16x16xf32>
    %cst_92 = arith.constant dense<0.000000e+00> : vector<4x16xf32>
    %133 = tpu.matmul %50, %132, %cst_92 {dimension_numbers = #tpu.dot_dimension_numbers<[1], [0], [0], [1], [0, 0, 1, 1], [], []>} : vector<4x16xf32>, vector<16x16xf32>, vector<4x16xf32> -> vector<4x16xf32>
    %134 = arith.addf %130, %133 : vector<4x16xf32>
    %c1_93 = arith.constant 1 : index
    %c0_94 = arith.constant 0 : index
    %c0_95 = arith.constant 0 : index
    %135 = vector.load %arg10[%c1_93, %c0_94, %c0_95] : memref<2x1x16xf32, #tpu.memory_space<vmem>>, vector<1x1x16xf32>
    %136 = vector.shape_cast %135 : vector<1x1x16xf32> to vector<1x16xf32>
    %137 = vector.broadcast %136 : vector<1x16xf32> to vector<4x16xf32>
    %138 = arith.addf %134, %137 : vector<4x16xf32>
    "tpu.trace_start"() <{level = 10 : i32, message = "cd,ed->ce"}> : () -> ()
    %cst_96 = arith.constant dense<0.000000e+00> : vector<4x4xf32>
    %139 = tpu.matmul %116, %127, %cst_96 {dimension_numbers = #tpu.dot_dimension_numbers<[1], [1], [0], [0], [0, 0, 1, 0], [], []>} : vector<4x16xf32>, vector<4x16xf32>, vector<4x4xf32> -> vector<4x4xf32>
    "tpu.trace_stop"() : () -> ()
    %cst_97 = arith.constant dense<0xFF800000> : vector<4xf32>
    %140 = vector.multi_reduction <maximumf>, %139, %cst_97 [1] : vector<4x4xf32> to vector<4xf32>
    %141 = vector.shape_cast %140 : vector<4xf32> to vector<4x1xf32>
    %142 = vector.broadcast %141 : vector<4x1xf32> to vector<4x4xf32>
    %143 = arith.subf %139, %142 : vector<4x4xf32>
    %144 = math.exp %143 : vector<4x4xf32>
    %cst_98 = arith.constant dense<0.000000e+00> : vector<4xf32>
    %145 = vector.multi_reduction <add>, %144, %cst_98 [1] : vector<4x4xf32> to vector<4xf32>
    %146 = vector.shape_cast %145 : vector<4xf32> to vector<4x1xf32>
    %147 = tpu.reciprocal %146 : vector<4x1xf32> -> vector<4x1xf32>
    %148 = vector.broadcast %147 : vector<4x1xf32> to vector<4x4xf32>
    %149 = arith.mulf %144, %148 : vector<4x4xf32>
    %cst_99 = arith.constant dense<0.000000e+00> : vector<4x16xf32>
    %150 = tpu.matmul %149, %138, %cst_99 {dimension_numbers = #tpu.dot_dimension_numbers<[1], [0], [0], [1], [0, 0, 1, 1], [], []>} : vector<4x4xf32>, vector<4x16xf32>, vector<4x16xf32> -> vector<4x16xf32>
    %c1_100 = arith.constant 1 : index
    %c0_101 = arith.constant 0 : index
    %c0_102 = arith.constant 0 : index
    %151 = vector.load %arg11[%c1_100, %c0_101, %c0_102] : memref<2x16x8xf32, #tpu.memory_space<vmem>>, vector<1x16x8xf32>
    %152 = vector.shape_cast %151 : vector<1x16x8xf32> to vector<16x8xf32>
    %cst_103 = arith.constant dense<0.000000e+00> : vector<4x8xf32>
    %153 = tpu.matmul %150, %152, %cst_103 {dimension_numbers = #tpu.dot_dimension_numbers<[1], [0], [0], [1], [0, 0, 1, 1], [], []>} : vector<4x16xf32>, vector<16x8xf32>, vector<4x8xf32> -> vector<4x8xf32>
    %154 = arith.addf %101, %153 : vector<4x8xf32>
    %c1_104 = arith.constant 1 : index
    %c0_105 = arith.constant 0 : index
    %c0_106 = arith.constant 0 : index
    %155 = vector.load %arg12[%c1_104, %c0_105, %c0_106] : memref<2x16x8xf32, #tpu.memory_space<vmem>>, vector<1x16x8xf32>
    %156 = vector.shape_cast %155 : vector<1x16x8xf32> to vector<16x8xf32>
    %cst_107 = arith.constant dense<0.000000e+00> : vector<4x8xf32>
    %157 = tpu.matmul %150, %156, %cst_107 {dimension_numbers = #tpu.dot_dimension_numbers<[1], [0], [0], [1], [0, 0, 1, 1], [], []>} : vector<4x16xf32>, vector<16x8xf32>, vector<4x8xf32> -> vector<4x8xf32>
    %158 = arith.addf %105, %157 : vector<4x8xf32>
    %c0_108 = arith.constant 0 : index
    %c0_109 = arith.constant 0 : index
    %159 = vector.load %arg13[%c0_108, %c0_109] : memref<1x8xf32, #tpu.memory_space<vmem>>, vector<1x8xf32>
    %160 = vector.broadcast %159 : vector<1x8xf32> to vector<4x8xf32>
    %161 = arith.addf %154, %160 : vector<4x8xf32>
    %c0_110 = arith.constant 0 : index
    %c0_111 = arith.constant 0 : index
    %162 = vector.load %arg14[%c0_110, %c0_111] : memref<1x8xf32, #tpu.memory_space<vmem>>, vector<1x8xf32>
    %163 = vector.broadcast %162 : vector<1x8xf32> to vector<4x8xf32>
    %164 = arith.addf %158, %163 : vector<4x8xf32>
    %cst_112 = arith.constant dense<0.000000e+00> : vector<8xf32>
    %165 = vector.multi_reduction <add>, %164, %cst_112 [0] : vector<4x8xf32> to vector<8xf32>
    %166 = vector.shape_cast %165 : vector<8xf32> to vector<1x8xf32>
    %cst_113 = arith.constant 4.000000e+00 : f32
    %167 = vector.broadcast %cst_113 : f32 to vector<1x8xf32>
    %168 = arith.divf %166, %167 : vector<1x8xf32>
    %c0_114 = arith.constant 0 : index
    %c0_115 = arith.constant 0 : index
    %c0_116 = arith.constant 0 : index
    %169 = vector.load %arg16[%c0_114, %c0_115, %c0_116] : memref<1x4x8xf32, #tpu.memory_space<vmem>>, vector<1x4x8xf32>
    %170 = vector.shape_cast %169 : vector<1x4x8xf32> to vector<4x8xf32>
    %171 = vector.shape_cast %161 : vector<4x8xf32> to vector<1x4x8xf32>
    tpu.vector_store %arg16[%c0_114, %c0_115, %c0_116], %171 {strides = array<i32>} : memref<1x4x8xf32, #tpu.memory_space<vmem>>, vector<1x4x8xf32>,
    %c0_117 = arith.constant 0 : index
    %c0_118 = arith.constant 0 : index
    %c0_119 = arith.constant 0 : index
    %172 = vector.load %arg17[%c0_117, %c0_118, %c0_119] : memref<1x1x8xf32, #tpu.memory_space<vmem>>, vector<1x1x8xf32>
    %173 = vector.shape_cast %172 : vector<1x1x8xf32> to vector<1x8xf32>
    %174 = vector.shape_cast %168 : vector<1x8xf32> to vector<1x1x8xf32>
    tpu.vector_store %arg17[%c0_117, %c0_118, %c0_119], %174 {strides = array<i32>} : memref<1x1x8xf32, #tpu.memory_space<vmem>>, vector<1x1x8xf32>,
    "tpu.trace_start"() <{level = 10 : i32, message = "co,cl->ol"}> : () -> ()
    %cst_120 = arith.constant dense<0.000000e+00> : vector<8x64xf32>
    %175 = tpu.matmul %161, %1, %cst_120 {dimension_numbers = #tpu.dot_dimension_numbers<[0], [0], [1], [1], [0, 1, 1, 1], [], []>} : vector<4x8xf32>, vector<4x64xf32>, vector<8x64xf32> -> vector<8x64xf32>
    %cst_121 = arith.constant 1.000000e+00 : f32
    "tpu.trace_stop"() : () -> ()
    %176 = vector.broadcast %cst_121 : f32 to vector<4x1xf32>
    "tpu.trace_start"() <{level = 10 : i32, message = "co,cx->ox"}> : () -> ()
    %cst_122 = arith.constant dense<0.000000e+00> : vector<8x1xf32>
    %177 = tpu.matmul %164, %176, %cst_122 {dimension_numbers = #tpu.dot_dimension_numbers<[0], [0], [1], [1], [0, 1, 1, 1], [], []>} : vector<4x8xf32>, vector<4x1xf32>, vector<8x1xf32> -> vector<8x1xf32>
    "tpu.trace_stop"() : () -> ()
    %cst_123 = arith.constant 2.500000e-01 : f32
    %178 = vector.broadcast %cst_123 : f32 to vector<8x1xf32>
    %179 = arith.mulf %177, %178 : vector<8x1xf32>
    %180 = vector.broadcast %179 : vector<8x1xf32> to vector<8x64xf32>
    %181 = arith.addf %175, %180 : vector<8x64xf32>
    %c0_124 = arith.constant 0 : index
    %c0_125 = arith.constant 0 : index
    %c0_126 = arith.constant 0 : index
    %182 = vector.load %arg15[%c0_124, %c0_125, %c0_126] : memref<1x8x64xf32, #tpu.memory_space<vmem>>, vector<1x8x64xf32>
    %183 = vector.shape_cast %182 : vector<1x8x64xf32> to vector<8x64xf32>
    %184 = vector.shape_cast %181 : vector<8x64xf32> to vector<1x8x64xf32>
    tpu.vector_store %arg15[%c0_124, %c0_125, %c0_126], %184 {strides = array<i32>} : memref<1x8x64xf32, #tpu.memory_space<vmem>>, vector<1x8x64xf32>,
    return
  }
  func.func @transform_0(%arg0: i32) -> (i32, i32, i32) {
    %c0_i32 = arith.constant 0 : i32
    %c0_i32_0 = arith.constant 0 : i32
    %c0_i32_1 = arith.constant 0 : i32
    return %arg0, %c0_i32, %c0_i32_0 : i32, i32, i32
  }
  func.func @transform_1(%arg0: i32) -> (i32, i32, i32) {
    %c0_i32 = arith.constant 0 : i32
    %c0_i32_0 = arith.constant 0 : i32
    %c0_i32_1 = arith.constant 0 : i32
    %c0_i32_2 = arith.constant 0 : i32
    return %c0_i32, %c0_i32_0, %c0_i32_1 : i32, i32, i32
  }
  func.func @transform_2(%arg0: i32) -> (i32, i32, i32) {
    %c0_i32 = arith.constant 0 : i32
    %c0_i32_0 = arith.constant 0 : i32
    %c0_i32_1 = arith.constant 0 : i32
    %c0_i32_2 = arith.constant 0 : i32
    return %c0_i32, %c0_i32_0, %c0_i32_1 : i32, i32, i32
  }
  func.func @transform_3(%arg0: i32) -> (i32, i32, i32) {
    %c0_i32 = arith.constant 0 : i32
    %c0_i32_0 = arith.constant 0 : i32
    %c0_i32_1 = arith.constant 0 : i32
    %c0_i32_2 = arith.constant 0 : i32
    return %c0_i32, %c0_i32_0, %c0_i32_1 : i32, i32, i32
  }
  func.func @transform_4(%arg0: i32) -> (i32, i32, i32) {
    %c0_i32 = arith.constant 0 : i32
    %c0_i32_0 = arith.constant 0 : i32
    %c0_i32_1 = arith.constant 0 : i32
    %c0_i32_2 = arith.constant 0 : i32
    return %c0_i32, %c0_i32_0, %c0_i32_1 : i32, i32, i32
  }
  func.func @transform_5(%arg0: i32) -> (i32, i32, i32) {
    %c0_i32 = arith.constant 0 : i32
    %c0_i32_0 = arith.constant 0 : i32
    %c0_i32_1 = arith.constant 0 : i32
    %c0_i32_2 = arith.constant 0 : i32
    return %c0_i32, %c0_i32_0, %c0_i32_1 : i32, i32, i32
  }
  func.func @transform_6(%arg0: i32) -> (i32, i32, i32) {
    %c0_i32 = arith.constant 0 : i32
    %c0_i32_0 = arith.constant 0 : i32
    %c0_i32_1 = arith.constant 0 : i32
    %c0_i32_2 = arith.constant 0 : i32
    return %c0_i32, %c0_i32_0, %c0_i32_1 : i32, i32, i32
  }
  func.func @transform_7(%arg0: i32) -> (i32, i32, i32) {
    %c0_i32 = arith.constant 0 : i32
    %c0_i32_0 = arith.constant 0 : i32
    %c0_i32_1 = arith.constant 0 : i32
    %c0_i32_2 = arith.constant 0 : i32
    return %c0_i32, %c0_i32_0, %c0_i32_1 : i32, i32, i32
  }
  func.func @transform_8(%arg0: i32) -> (i32, i32, i32) {
    %c0_i32 = arith.constant 0 : i32
    %c0_i32_0 = arith.constant 0 : i32
    %c0_i32_1 = arith.constant 0 : i32
    %c0_i32_2 = arith.constant 0 : i32
    return %c0_i32, %c0_i32_0, %c0_i32_1 : i32, i32, i32
  }
  func.func @transform_9(%arg0: i32) -> (i32, i32, i32) {
    %c0_i32 = arith.constant 0 : i32
    %c0_i32_0 = arith.constant 0 : i32
    %c0_i32_1 = arith.constant 0 : i32
    %c0_i32_2 = arith.constant 0 : i32
    return %c0_i32, %c0_i32_0, %c0_i32_1 : i32, i32, i32
  }
  func.func @transform_10(%arg0: i32) -> (i32, i32, i32) {
    %c0_i32 = arith.constant 0 : i32
    %c0_i32_0 = arith.constant 0 : i32
    %c0_i32_1 = arith.constant 0 : i32
    %c0_i32_2 = arith.constant 0 : i32
    return %c0_i32, %c0_i32_0, %c0_i32_1 : i32, i32, i32
  }
  func.func @transform_11(%arg0: i32) -> (i32, i32, i32) {
    %c0_i32 = arith.constant 0 : i32
    %c0_i32_0 = arith.constant 0 : i32
    %c0_i32_1 = arith.constant 0 : i32
    %c0_i32_2 = arith.constant 0 : i32
    return %c0_i32, %c0_i32_0, %c0_i32_1 : i32, i32, i32
  }
  func.func @transform_12(%arg0: i32) -> (i32, i32) {
    %c0_i32 = arith.constant 0 : i32
    %c0_i32_0 = arith.constant 0 : i32
    %c0_i32_1 = arith.constant 0 : i32
    return %c0_i32, %c0_i32_0 : i32, i32
  }
  func.func @transform_13(%arg0: i32) -> (i32, i32) {
    %c0_i32 = arith.constant 0 : i32
    %c0_i32_0 = arith.constant 0 : i32
    %c0_i32_1 = arith.constant 0 : i32
    return %c0_i32, %c0_i32_0 : i32, i32
  }
  func.func @transform_14(%arg0: i32) -> (i32, i32, i32) {
    %c0_i32 = arith.constant 0 : i32
    %c0_i32_0 = arith.constant 0 : i32
    %c0_i32_1 = arith.constant 0 : i32
    return %arg0, %c0_i32, %c0_i32_0 : i32, i32, i32
  }
  func.func @transform_15(%arg0: i32) -> (i32, i32, i32) {
    %c0_i32 = arith.constant 0 : i32
    %c0_i32_0 = arith.constant 0 : i32
    %c0_i32_1 = arith.constant 0 : i32
    return %arg0, %c0_i32, %c0_i32_0 : i32, i32, i32
  }
  func.func @transform_16(%arg0: i32) -> (i32, i32, i32) {
    %c0_i32 = arith.constant 0 : i32
    %c0_i32_0 = arith.constant 0 : i32
    %c0_i32_1 = arith.constant 0 : i32
    return %arg0, %c0_i32, %c0_i32_0 : i32, i32, i32
  }
}

</mosaic_0001>

<bundles_post_ra>
// kernel: tpu_custom_call.1
= control target key start
LH: loop header
LB: loop body
LE: loop exit
PB: predicated region body
PF: predicated region fallthrough
CT: control target
= control target key end

     0   :  { %s3961_s0 = inlined_call_operand.vmem [shape: f32[2,4,64], index: 0, kind: input, shape index: {}]   ;;  %s3962_s1 = inlined_call_operand.vmem [shape: f32[2,64,16], index: 1, kind: input, shape index: {}]   ;;  %s3963_s2 = inlined_call_operand.vmem [shape: f32[2,16,16], index: 2, kind: input, shape index: {}]   ;;  %s3964_s3 = inlined_call_operand.vmem [shape: f32[2,1,16], index: 3, kind: input, shape index: {}]   ;;  %s3965_s4 = inlined_call_operand.vmem [shape: f32[2,64,16], index: 4, kind: input, shape index: {}]   ;;  %s3966_s5 = inlined_call_operand.vmem [shape: f32[2,16,16], index: 5, kind: input, shape index: {}]   ;;  %s3967_s6 = inlined_call_operand.vmem [shape: f32[2,1,16], index: 6, kind: input, shape index: {}]   ;;  %s3968_s7 = inlined_call_operand.vmem [shape: f32[2,64,16], index: 7, kind: input, shape index: {}]   ;;  %s3969_s8 = inlined_call_operand.vmem [shape: f32[2,16,16], index: 8, kind: input, shape index: {}]   ;;  %s3970_s9 = inlined_call_operand.vmem [shape: f32[2,1,16], index: 9, kind: input, shape index: {}]   ;;  %s3971_s10 = inlined_call_operand.vmem [shape: f32[2,16,8], index: 10, kind: input, shape index: {}]   ;;  %s3972_s11 = inlined_call_operand.vmem [shape: f32[2,16,8], index: 11, kind: input, shape index: {}]   ;;  %s3973_s12 = inlined_call_operand.vmem [shape: f32[1,8], index: 12, kind: input, shape index: {}]   ;;  %s3974_s13 = inlined_call_operand.vmem [shape: f32[1,8], index: 13, kind: input, shape index: {}]   ;;  %s3975_s14 = inlined_call_operand.hbm [shape: f32[2,8,64], index: 14, kind: output, shape index: {0}]   ;;  %s3976_s15 = inlined_call_operand.hbm [shape: f32[2,4,8], index: 15, kind: output, shape index: {1}]   ;;  %s3977_s16 = inlined_call_operand.hbm [shape: f32[2,1,8], index: 16, kind: output, shape index: {2}]  }
   0x1   :  { %3984 = sst [smem:[#allocation13_spill]] %s3961_s0 }
   0x2   :  { %3985 = sst [smem:[#allocation14_spill]] %s3962_s1 }
   0x3   :  { %3986 = sst [smem:[#allocation15_spill]] %s3963_s2 }
   0x4   :  { %3987 = sst [smem:[#allocation16_spill]] %s3964_s3 }
   0x5   :  { %3988 = sst [smem:[#allocation17_spill]] %s3965_s4 }
   0x6   :  { %22 = vsyncpa [#allocation3], 0 }
   0x7   :  { %24 = vsyncpa [#allocation3 + $0x1], 0 }
   0x8   :  { %25 = vsyncpa [#allocation5], 0 }
   0x9   :  { %27 = vsyncpa [#allocation5 + $0x1], 0  ;;  %s3412_s21 = smov 0   ;;  %s3414_s22 = smov 0  }
   0xa   :  { %s3416_s23 = smov 0   ;;  %s3418_s24 = smov 0  }
   0xb LB: > { %3989 = sst [smem:[#allocation9_spill]] %s3313_s23  ;;  %s3433_s25 = sadd.s32 4294967295, %s3317_s24   ;;  %s3317_s24 = sphi %s3418_s24, %s4003_s24   ;;  %s3313_s23 = sphi %s3416_s23, %s4005_s23   ;;  %s3309_s22 = sphi %s3414_s22, %s4007_s22   ;;  %s3305_s21 = sphi %s3412_s21, %s4006_s21  }
   0xc   : > { %s3978_s26 = sadd.s32 4294967294, %s3317_s24   ;;  %s3437_s27 = sadd.s32 1, %s3317_s24  }
   0xd   : > { %3990 = sst [smem:[#allocation10_spill]] %s3437_s27  ;;  %s339_s28 = sadd.s32 1, %s3313_s23 }
   0xe   : > { %s336_s29 = ssub.s32 %s3317_s24, %s3437_s27  ;;  %p349_p0 = scmp.ne.s32.totalorder %s3313_s23, %s3309_s22 }
   0xf   : > { %p337_p1 = scmp.eq.s32.totalorder %s336_s29, 0  ;;  %p350_p2 = scmp.eq.s32.totalorder %s3433_s25, 1 }
  0x10   : > { %p355_p3 = scmp.ne.s32.totalorder %s3309_s22, %s3305_s21  ;;  %p356_p4 = scmp.eq.s32.totalorder %s3978_s26, 1 }
  0x11   : > { %s3450_s30 = scalar_select %p337_p1, %s3313_s23, %s339_s28  }
  0x12   : > { %p3452_p5 = por %p350_p2, %p349_p0  ;;  %p3456_p6 = por %p356_p4, %p355_p3 }
  0x13   : > { %3991 = sst [smem:[#allocation11_spill]] %s3450_s30  ;;  %p2636_p7 = scmp.ge.s32.totalorder %s3317_s24, 1 }
  0x14   : > { %s3993_s17 = scalar_select %p3456_p6, 1, 0 }
  0x15   : > { %p472_p8 = scmp.lt.s32.totalorder %s3317_s24, 3 }
  0x16   : > { %3994 = sst [smem:[#allocation12_spill]] %s3993_s17 }
  0x17   : > { %p473_p9 = pnand %p2636_p7, %p472_p8 }
  0x18   : > { %p530_p10 = scmp.lt.s32.totalorder (!%p473_p9), %s3433_s25, 1  ;;  %vm535_vm0 = vcmask (!%p473_p9), 27648   ;;  %vm543_vm1 = vcmask (!%p473_p9), 93248   ;;  %s3995_s29 = sld [smem:[#allocation13_spill]] (!%p473_p9)  ;;  %vm539_vm2 = vcmask (!%p473_p9), 60448   ;;  %vm547_vm3 = vcmask (!%p473_p9), 126048  }
  0x19   : > { %476 = sbr.rel (%p473_p9) target bundleno = 2660 (0xa64), region = 76  ;;  %vm551_vm4 = vcmask (!%p473_p9), 158848   ;;  %vm555_vm5 = vcmask (!%p473_p9), 191648   ;;  %vm559_vm6 = vcmask (!%p473_p9), 224448   ;;  %vm563_vm7 = vcmask (!%p473_p9), 257248   ;;  %s3996_s1 = sld [smem:[#allocation14_spill]] (!%p473_p9) }
  0x1a   : > { %vm567_vm8 = vcmask (!%p473_p9), 290048   ;;  %vm571_vm9 = vcmask (!%p473_p9), 322848   ;;  %vm575_vm10 = vcmask (!%p473_p9), 355648   ;;  %vm579_vm11 = vcmask (!%p473_p9), 388448   ;;  %s3997_s2 = sld [smem:[#allocation15_spill]] (!%p473_p9)  ;;  %v961_v32 = vld [vmem:[%s3969_s8] sm:$0xff] (!%p473_p9) }
  0x1b   : > { %vm583_vm12 = vcmask (!%p473_p9), 421248   ;;  %vm587_vm13 = vcmask (!%p473_p9), 454048   ;;  %vm591_vm14 = vcmask (!%p473_p9), 486848   ;;  %vm595_vm15 = vcmask (!%p473_p9), 519648   ;;  %v962_v34 = vld [vmem:[%s3969_s8 + $0x8] sm:$0xff] (!%p473_p9)  ;;  %v803_v62 = vld [vmem:[%s3966_s5] sm:$0xff] (!%p473_p9) }
  0x1c   : > { %v3319_v18 = vmov (!%p473_p9), 0.0|0.0   ;;  %v3321_v35 = vmov (!%p473_p9), 0.0   ;;  %v3061_v36 = vpack.c.bf16 (!%p473_p9), %v962_v34, %v961_v32  ;;  %s3998_s4 = sld [smem:[#allocation17_spill]] (!%p473_p9)  ;;  %v2675_v32 = vld [vmem:[%s3966_s5 + $0x10] sm:$0xff] (!%p473_p9)  ;;  %s3999_s3 = sld [smem:[#allocation16_spill]] (!%p473_p9) }
  0x1d   : > { %3033 = vmatprep.subr.bf16.mxu1 (!%p473_p9), %v3319_v18  ;;  %3030 = vmatprep.subr.bf16.mxu0 (!%p473_p9), %v3319_v18 }
  0x1f   : > { %v629_v15 = vld [vmem:[%s3996_s1] sm:$0xff] (!%p473_p9)  ;;  %v630_v16 = vld [vmem:[%s3996_s1 + $0x8] sm:$0xff] (!%p473_p9)  ;;  %v631_v21 = vld [vmem:[%s3996_s1 + $0x10] sm:$0xff] (!%p473_p9) }
  0x20   : > { %s531_s18 = scalar_select %p530_p10, %s3433_s25, 1  ;;  %v3034_v17 = vpack.c.bf16 %v630_v16, %v629_v15  ;;  %v632_v22 = vld [vmem:[%s3996_s1 + $0x18] sm:$0xff]  ;;  %v633_v24 = vld [vmem:[%s3996_s1 + $0x20] sm:$0xff]  ;;  %v634_v25 = vld [vmem:[%s3996_s1 + $0x28] sm:$0xff] }
  0x21   : > { %v3037_v23 = vpack.c.bf16 %v632_v22, %v631_v21  ;;  %v3040_v26 = vpack.c.bf16 %v634_v25, %v633_v24  ;;  %v635_v27 = vld [vmem:[%s3996_s1 + $0x30] sm:$0xff]  ;;  %v636_v28 = vld [vmem:[%s3996_s1 + $0x38] sm:$0xff]  ;;  %v637_v30 = vld [vmem:[%s3997_s2] sm:$0xff] }
  0x22   : > { %s2639_s19 = sshll.u32 %s531_s18, 2  ;;  %3035 = vmatpush3.bf16.msra.mxu1 %v3034_v17  ;;  %v3043_v29 = vpack.c.bf16 %v636_v28, %v635_v27  ;;  %v638_v31 = vld [vmem:[%s3997_s2 + $0x8] sm:$0xff]  ;;  %v797_v17 = vld [vmem:[%s3998_s4 + $0x10] sm:$0xff]  ;;  %v799_v24 = vld [vmem:[%s3998_s4 + $0x20] sm:$0xff]  ;;  %s2716_s18 = sshll.u32 %s3433_s25, 6 }
  0x23   : > { %s533_s26 = scalar_lea.vmem %s3995_s29, %s2639_s19  ;;  %3036 = vmatprep.subr.bf16.mxu1 %v3319_v18  ;;  %v3031_v33 = vpack.c.bf16 %v638_v31, %v637_v30  ;;  %v958_v21 = vld [vmem:[%s3968_s7 + $0x28] sm:$0xff]  ;;  %v960_v27 = vld [vmem:[%s3968_s7 + $0x38] sm:$0xff]  ;;  %v801_v30 = vld [vmem:[%s3998_s4 + $0x30] sm:$0xff]  ;;  %s3843_s19 = sand.u32 1, %s3309_s22  }
  0x24   : > { %v3467_v0 = vld [vmem:[%s533_s26] sm:$0xf]  ;;  %v800_v25 = vld [vmem:[%s3998_s4 + $0x28] sm:$0xff]  ;;  %v802_v31 = vld [vmem:[%s3998_s4 + $0x38] sm:$0xff]  ;;  %s2638_s20 = sshll.u32 %s3843_s19, 2  ;;  %s3983_s17 = scalar_lea.vmem [#allocation6], %s3843_s19 }
  0x25   : > { %v536_v1 = vsel %vm535_vm0, %v3467_v0, -inf  ;;  %v544_v2 = vsel %vm543_vm1, %v3467_v0, -inf  ;;  %v540_v3 = vsel %vm539_vm2, %v3467_v0, -inf  ;;  %v548_v4 = vsel %vm547_vm3, %v3467_v0, -inf  ;;  %3032 = vmatpush3.bf16.msra.mxu0 %v3031_v33  ;;  %v2676_v33 = vld [vmem:[%s3966_s5 + $0x18] sm:$0xff]  ;;  %s3852_s27 = scalar_lea.vmem [#allocation4], %s2638_s20  ;;  %s3867_s30 = scalar_lea.hbm %s3976_s15, %s2716_s18 }
  0x26   : > { %537 = vmax.xlane.f32.xlu0 %v536_v1  ;;  %545 = vmax.xlane.f32.xlu1 %v544_v2  ;;  %v552_v5 = vsel %vm551_vm4, %v3467_v0, -inf  ;;  %v556_v6 = vsel %vm555_vm5, %v3467_v0, -inf  ;;  %v560_v7 = vsel %vm559_vm6, %v3467_v0, -inf  ;;  %v564_v8 = vsel %vm563_vm7, %v3467_v0, -inf  ;;  %v804_v1 = vld [vmem:[%s3966_s5 + $0x8] sm:$0xff]  ;;  %v953_v2 = vld [vmem:[%s3968_s7] sm:$0xff] }
  0x27   : > { %v568_v9 = vsel %vm567_vm8, %v3467_v0, -inf  ;;  %v572_v10 = vsel %vm571_vm9, %v3467_v0, -inf  ;;  %v576_v11 = vsel %vm575_vm10, %v3467_v0, -inf  ;;  %v580_v12 = vsel %vm579_vm11, %v3467_v0, -inf  ;;  %3038 = vmatpush3.bf16.msra.mxu1 %v3037_v23  ;;  %3045 = vmatprep.subr.bf16.mxu0 %v3319_v18  ;;  %s2473_s26 = sand.u32 1, %s3433_s25   ;;  %s2504_s28 = sshll.u32 %s3852_s27, 4  ;;  %s2505_s28 = int_to_ptr.vmem [resolvable:$true] %s2504_s28 }
  0x28   : > { %v584_v13 = vsel %vm583_vm12, %v3467_v0, -inf  ;;  %v588_v14 = vsel %vm587_vm13, %v3467_v0, -inf  ;;  %v592_v19 = vsel %vm591_vm14, %v3467_v0, -inf  ;;  %v596_v20 = vsel %vm595_vm15, %v3467_v0, -inf  ;;  %3039 = vmatprep.subr.bf16.mxu1 %v3319_v18  ;;  %s3870_s29 = scalar_lea.sflag [#allocation5], %s2473_s26 }
  0x29   : > { %vm3320_vm1 = vmmov 0   ;;  %vm713_vm2 = vcmask 523264   ;;  %vm599_vm3 = vcmask 7168   ;;  %vm601_vm4 = vcmask 15360  }
  0x2a   : > { %541 = vmax.xlane.f32.xlu0 %v540_v3  ;;  %549 = vmax.xlane.f32.xlu1 %v548_v4  ;;  %vm603_vm5 = vcmask 23552   ;;  %vm605_vm6 = vcmask 31744   ;;  %vm607_vm7 = vcmask 39936   ;;  %vm609_vm8 = vcmask 48128   ;;  %v954_v3 = vld [vmem:[%s3968_s7 + $0x8] sm:$0xff] }
  0x2b   : > { %3041 = vmatpush3.bf16.msra.mxu1 %v3040_v26  ;;  %2839 = vmatprep.mubr.msk.f32.mxu1 %vm3320_vm1, %v3321_v35  ;;  %vm611_vm9 = vcmask 56320   ;;  %vm613_vm10 = vcmask 64512   ;;  %vm615_vm11 = vcmask 72704   ;;  %vm617_vm12 = vcmask 80896   ;;  %v959_v26 = vld [vmem:[%s3968_s7 + $0x30] sm:$0xff] }
  0x2c   : > { %3042 = vmatprep.subr.bf16.mxu1 %v3319_v18  ;;  %2820 = vmatprep.mubr.msk.f32.mxu0 %vm3320_vm1, %v3321_v35  ;;  %vm619_vm13 = vcmask 89088   ;;  %vm621_vm14 = vcmask 97280   ;;  %vm623_vm15 = vcmask 105472   ;;  %v3055_v28 = vpack.c.bf16 %v800_v25, %v799_v24  ;;  %v2661_v25 = vld [vmem:[%s3997_s2 + $0x10] sm:$0xff] }
  0x2d   : > { %v3058_v34 = vpack.c.bf16 %v802_v31, %v801_v30  ;;  %v2653_v30 = vld [vmem:[%s3996_s1 + $0x40] sm:$0xff]  ;;  %v2654_v31 = vld [vmem:[%s3996_s1 + $0x48] sm:$0xff] }
  0x2e   : > { %553 = vmax.xlane.f32.xlu0 %v552_v5  ;;  %557 = vmax.xlane.f32.xlu1 %v556_v6 }
  0x2f   : > { %3044 = vmatpush3.bf16.msra.mxu1 %v3043_v29  ;;  %v3073_v29 = vpack.c.bf16 %v960_v27, %v959_v26  ;;  %v2662_v26 = vld [vmem:[%s3997_s2 + $0x18] sm:$0xff] }
  0x30   : > { %3060 = vmatprep.subr.bf16.mxu1 %v3319_v18 }
  0x32   : > { %561 = vmax.xlane.f32.xlu0 %v560_v7  ;;  %565 = vmax.xlane.f32.xlu1 %v564_v8  ;;  %v3046_v7 = vpack.c.bf16 %v804_v1, %v803_v62  ;;  %v3064_v8 = vpack.c.bf16 %v954_v3, %v953_v2  ;;  %v2645_v62 = vld [vmem:[%s3967_s6] ss:$0 sm:$0xff] }
  0x33   : > { %2840 = vmatmul.mubr.msk.f32.vlgmr.msra.gmra.mrb[0].mxu1 %vm713_vm2, %v3467_v0 }
  0x34   : > { %3062 = vmatpush3.bf16.msra.mxu1 %v3061_v36  ;;  %2872 = vmatprep.mubr.msk.f32.mxu1 %vm3320_vm1, %v3321_v35  ;;  %v3091_v36 = vpack.c.bf16 %v2676_v33, %v2675_v32  ;;  %v3079_v32 = vpack.c.bf16 %v2654_v31, %v2653_v30  ;;  %v2655_v33 = vld [vmem:[%s3996_s1 + $0x50] sm:$0xff]  ;;  %v1276_v30 = vld [vmem:[%s3971_s10 + $0x8] sm:$0xff] }
  0x35   : > { %3063 = vmatprep.subr.bf16.mxu1 %v3319_v18 }
  0x36   : > { %569 = vmax.xlane.f32.xlu0 %v568_v9  ;;  %573 = vmax.xlane.f32.xlu1 %v572_v10  ;;  %v795_v9 = vld [vmem:[%s3998_s4] sm:$0xff] }
  0x3a   : > { %577 = vmax.xlane.f32.xlu0 %v576_v11  ;;  %581 = vmax.xlane.f32.xlu1 %v580_v12  ;;  %v796_v11 = vld [vmem:[%s3998_s4 + $0x8] sm:$0xff]  ;;  %v955_v12 = vld [vmem:[%s3968_s7 + $0x10] sm:$0xff] }
  0x3b   : > { %v3049_v15 = vpack.c.bf16 %v796_v11, %v795_v9 }
  0x3e   : > { %585 = vmax.xlane.f32.xlu0 %v584_v13  ;;  %589 = vmax.xlane.f32.xlu1 %v588_v14  ;;  %v956_v13 = vld [vmem:[%s3968_s7 + $0x18] sm:$0xff] }
  0x3f   : > { %v3067_v16 = vpack.c.bf16 %v956_v13, %v955_v12 }
  0x42   : > { %593 = vmax.xlane.f32.xlu0 %v592_v19  ;;  %597 = vmax.xlane.f32.xlu1 %v596_v20  ;;  %v798_v19 = vld [vmem:[%s3998_s4 + $0x18] sm:$0xff]  ;;  %v957_v20 = vld [vmem:[%s3968_s7 + $0x20] sm:$0xff] }
  0x43   : > { %v3052_v22 = vpack.c.bf16 %v798_v19, %v797_v17  ;;  %v3070_v23 = vpack.c.bf16 %v958_v21, %v957_v20 }
  0xb3   : > { %v538_v37 = vpop.xlane.xlu0 %537  ;;  %v546_v38 = vpop.xlane.xlu1 %545 }
  0xb7   : > { %v542_v39 = vpop.xlane.xlu0 %541  ;;  %v550_v40 = vpop.xlane.xlu1 %549 }
  0xb8   : > { %v600_v41 = vsel %vm599_vm3, %v538_v37, %v542_v39  ;;  %vm625_vm3 = vcmask 113664   ;;  %v2667_v37 = vld [vmem:[%s3998_s4 + $0x40] sm:$0xff] }
  0xb9   : > { %v602_v42 = vsel %vm601_vm4, %v600_v41, %v546_v38  ;;  %vm627_vm4 = vcmask 121856   ;;  %v2668_v38 = vld [vmem:[%s3998_s4 + $0x48] sm:$0xff]  ;;  %v2670_v41 = vld [vmem:[%s3998_s4 + $0x58] sm:$0xff] }
  0xba   : > { %v604_v43 = vsel %vm603_vm5, %v602_v42, %v550_v40  ;;  %vm639_vm5 = vcmask 130048   ;;  %v3094_v39 = vpack.c.bf16 %v2668_v38, %v2667_v37  ;;  %v2669_v40 = vld [vmem:[%s3998_s4 + $0x50] sm:$0xff]  ;;  %v2657_v37 = vld [vmem:[%s3996_s1 + $0x60] sm:$0xff]  ;;  %v2658_v38 = vld [vmem:[%s3996_s1 + $0x68] sm:$0xff] }
  0xbb   : > { %v554_v44 = vpop.xlane.xlu0 %553  ;;  %v558_v45 = vpop.xlane.xlu1 %557  ;;  %v3097_v42 = vpack.c.bf16 %v2670_v41, %v2669_v40  ;;  %v2659_v40 = vld [vmem:[%s3996_s1 + $0x70] sm:$0xff]  ;;  %v2660_v41 = vld [vmem:[%s3996_s1 + $0x78] sm:$0xff] }
  0xbc   : > { %v606_v46 = vsel %vm605_vm6, %v604_v43, %v554_v44  ;;  %v2671_v43 = vld [vmem:[%s3998_s4 + $0x60] sm:$0xff]  ;;  %v2672_v44 = vld [vmem:[%s3998_s4 + $0x68] sm:$0xff] }
  0xbd   : > { %v608_v47 = vsel %vm607_vm7, %v606_v46, %v558_v45  ;;  %v3100_v45 = vpack.c.bf16 %v2672_v44, %v2671_v43  ;;  %v2673_v46 = vld [vmem:[%s3998_s4 + $0x70] sm:$0xff]  ;;  %vm1201_vm7 = vcmask 1043456   ;;  %v2690_v44 = vld [vmem:[%s3969_s8 + $0x18] sm:$0xff] }
  0xbe   : > { %v2689_v43 = vld [vmem:[%s3969_s8 + $0x10] sm:$0xff] }
  0xbf   : > { %v562_v48 = vpop.xlane.xlu0 %561  ;;  %v566_v49 = vpop.xlane.xlu1 %565 }
  0xc0   : > { %v610_v50 = vsel %vm609_vm8, %v608_v47, %v562_v48  ;;  %v2674_v47 = vld [vmem:[%s3998_s4 + $0x78] sm:$0xff] }
  0xc1   : > { %v612_v51 = vsel %vm611_vm9, %v610_v50, %v566_v49  ;;  %v3103_v48 = vpack.c.bf16 %v2674_v47, %v2673_v46  ;;  %v2681_v46 = vld [vmem:[%s3968_s7 + $0x40] sm:$0xff]  ;;  %v2682_v47 = vld [vmem:[%s3968_s7 + $0x48] sm:$0xff] }
  0xc3   : > { %v570_v52 = vpop.xlane.xlu0 %569  ;;  %v574_v53 = vpop.xlane.xlu1 %573 }
  0xc4   : > { %v614_v54 = vsel %vm613_vm10, %v612_v51, %v570_v52 }
  0xc5   : > { %v616_v55 = vsel %vm615_vm11, %v614_v54, %v574_v53 }
  0xc7   : > { %v578_v56 = vpop.xlane.xlu0 %577  ;;  %v582_v57 = vpop.xlane.xlu1 %581 }
  0xc8   : > { %v618_v58 = vsel %vm617_vm12, %v616_v55, %v578_v56 }
  0xc9   : > { %v620_v59 = vsel %vm619_vm13, %v618_v58, %v582_v57 }
  0xcb   : > { %v586_v60 = vpop.xlane.xlu0 %585  ;;  %v590_v61 = vpop.xlane.xlu1 %589 }
  0xcc   : > { %v622_v63 = vsel %vm621_vm14, %v620_v59, %v586_v60 }
  0xcd   : > { %v624_v4 = vsel %vm623_vm15, %v622_v63, %v590_v61 }
  0xcf   : > { %v594_v5 = vpop.xlane.xlu0 %593  ;;  %v598_v6 = vpop.xlane.xlu1 %597 }
  0xd0   : > { %v626_v10 = vsel %vm625_vm3, %v624_v4, %v594_v5  ;;  %v2642_v4 = vld [vmem:[%s3999_s3] ss:$0 sm:$0xff] }
  0xd1   : > { %v3563_v14 = vsel %vm627_vm4, %v626_v10, %v598_v6  ;;  %v2648_v6 = vld [vmem:[%s3970_s9] ss:$0 sm:$0xff]  ;;  %v2680_v10 = vld [vmem:[%s3967_s6 + $0x1] ss:$0 sm:$0xff] }
  0xd2   : > { %2821 = vmatmul.mubr.msk.f32.vlgmr.msra.gmra.mrb[0].mxu0 %vm639_vm5, %v3563_v14  ;;  %2873 = vmatmul.mubr.msk.f32.vlgmr.msra.gmra.mrb[2].mxu1 %vm639_vm5, %v3563_v14 }
  0xd3   : > { %3047 = vmatpush3.bf16.msra.mxu0 %v3046_v7  ;;  %3065 = vmatpush3.bf16.msra.mxu1 %v3064_v8 }
  0xd4   : > { %2846 = vmatprep.mubr.msk.f32.mxu0 %vm3320_vm1, %v3321_v35  ;;  %3048 = vmatprep.subr.bf16.mxu0 %v3319_v18 }
  0xd5   : > { %3066 = vmatprep.subr.bf16.mxu1 %v3319_v18  ;;  %2891 = vmatprep.mubr.msk.f32.mxu1 %vm3320_vm1, %v3321_v35 }
  0xd6   : > { %2847 = vmatmul.mubr.msk.f32.vlgmr.msra.gmra.mrb[2].mxu0 %vm639_vm5, %v3563_v14 }
  0xd7   : > { %3050 = vmatpush3.bf16.msra.mxu0 %v3049_v15  ;;  %3068 = vmatpush3.bf16.msra.mxu1 %v3067_v16 }
  0xd8   : > { %3051 = vmatprep.subr.bf16.mxu0 %v3319_v18  ;;  %3069 = vmatprep.subr.bf16.mxu1 %v3319_v18 }
  0xd9   : > { %2865 = vmatprep.mubr.msk.f32.mxu0 %vm3320_vm1, %v3321_v35 }
  0xdb   : > { %3053 = vmatpush3.bf16.msra.mxu0 %v3052_v22  ;;  %3071 = vmatpush3.bf16.msra.mxu1 %v3070_v23 }
  0xdc   : > { %3054 = vmatprep.subr.bf16.mxu0 %v3319_v18  ;;  %3072 = vmatprep.subr.bf16.mxu1 %v3319_v18 }
  0xdf   : > { %3056 = vmatpush3.bf16.msra.mxu0 %v3055_v28  ;;  %3074 = vmatpush3.bf16.msra.mxu1 %v3073_v29  ;;  %v3076_v28 = vpack.c.bf16 %v2662_v26, %v2661_v25  ;;  %v2700_v25 = vld [vmem:[%s3971_s10 + $0x18] sm:$0xff] }
  0xe0   : > { %3057 = vmatprep.subr.bf16.mxu0 %v3319_v18  ;;  %3090 = vmatprep.subr.bf16.mxu1 %v3319_v18 }
  0xe2   : > { %2892 = vmatmul.mubr.msk.f32.vlgmr.msra.gmra.mrb[4].mxu1 %vm713_vm2, %v3467_v0 }
  0xe3   : > { %3059 = vmatpush3.bf16.msra.mxu0 %v3058_v34  ;;  %3092 = vmatpush3.bf16.msra.mxu1 %v3091_v36  ;;  %v2656_v34 = vld [vmem:[%s3996_s1 + $0x58] sm:$0xff]  ;;  %s3324_s1 = smov [#allocation4]  }
  0xe4   : > { %2934 = vmatprep.mubr.msk.f32.mxu1 %vm3320_vm1, %v3321_v35  ;;  %3093 = vmatprep.subr.bf16.mxu1 %v3319_v18  ;;  %v3082_v36 = vpack.c.bf16 %v2656_v34, %v2655_v33  ;;  %v1278_v33 = vld [vmem:[%s3972_s11 + $0x8] sm:$0xff]  ;;  %s3199_s2 = sshll.u32 %s3324_s1, 4  ;;  %s3200_s2 = int_to_ptr.vmem [resolvable:$false] %s3199_s2 }
  0xe5   : > { %2894 = vmatprep.subr.mxu0 %v3321_v35  ;;  %p3202_p0 = scmp.lt.s32.totalorder %s2505_s28, %s3200_s2 }
  0xe6   : > { %2866 = vmatmul.mubr.msk.f32.vlgmr.msra.gmra.mrb[4].mxu0 %vm713_vm2, %v3467_v0  ;;  %2935 = vmatmul.mubr.msk.f32.vlgmr.msra.gmra.mrb[6].mxu1 %vm639_vm5, %v3563_v14 }
  0xe7   : > { %3095 = vmatpush3.bf16.msra.mxu1 %v3094_v39  ;;  %2953 = vmatprep.mubr.msk.f32.mxu1 %vm3320_vm1, %v3321_v35  ;;  %v3085_v39 = vpack.c.bf16 %v2658_v38, %v2657_v37 }
  0xe8   : > { %3096 = vmatprep.subr.bf16.mxu1 %v3319_v18  ;;  %2896 = vmatprep.mubr.msk.f32.mxu0 %vm3320_vm1, %v3321_v35 }
  0xeb   : > { %3098 = vmatpush3.bf16.msra.mxu1 %v3097_v42  ;;  %v3088_v42 = vpack.c.bf16 %v2660_v41, %v2659_v40 }
  0xec   : > { %3099 = vmatprep.subr.bf16.mxu1 %v3319_v18 }
  0xef   : > { %3101 = vmatpush3.bf16.msra.mxu1 %v3100_v45  ;;  %v3106_v45 = vpack.c.bf16 %v2690_v44, %v2689_v43  ;;  %v2707_v43 = vld [vmem:[%s3973_s12] ss:$0 sm:$0xff] }
  0xf0   : > { %3102 = vmatprep.subr.bf16.mxu1 %v3319_v18 }
  0xf3   : > { %3104 = vmatpush3.bf16.msra.mxu1 %v3103_v48  ;;  %v3109_v48 = vpack.c.bf16 %v2682_v47, %v2681_v46  ;;  %v2708_v46 = vld [vmem:[%s3974_s13] ss:$0 sm:$0xff] }
  0xf4   : > { %2982 = vmatprep.subr.mxu1 %v3321_v35 }
  0xf6   : > { %2954 = vmatmul.mubr.msk.f32.vlgmr.msra.gmra.mrb[8].mxu1 %vm713_vm2, %v3467_v0 }
  0xf7   : > { %2984 = vmatprep.mubr.msk.f32.mxu1 %vm3320_vm1, %v3321_v35 }
 0x106   : > { %v783_v49 = vpop.f32.mrb[0].mxu1 }
 0x107   : > { %v2841_v50 = vpop.f32.mrb[1].mxu1 }
 0x108   : > { %v2684_v50 = vld [vmem:[%s3968_s7 + $0x58] sm:$0xff] }
 0x1a5   : > { %v709_v51 = vpop.f32.mrb[0].mxu0  ;;  %v1029_v52 = vpop.f32.mrb[2].mxu1 }
 0x1a6   : > { %v784_v53 = vadd.f32 %v783_v49, %v709_v51  ;;  %v2822_v54 = vpop.f32.mrb[1].mxu0  ;;  %v2874_v55 = vpop.f32.mrb[3].mxu1  ;;  %v2683_v49 = vld [vmem:[%s3968_s7 + $0x50] sm:$0xff] }
 0x1a7   : > { %v3112_v51 = vpack.c.bf16 %v2684_v50, %v2683_v49  ;;  %v2688_v55 = vld [vmem:[%s3968_s7 + $0x78] sm:$0xff] }
 0x1a8   : > { %v794_v7 = vadd.f32 %v2642_v4, %v784_v53  ;;  %v2686_v53 = vld [vmem:[%s3968_s7 + $0x68] sm:$0xff] }
 0x1a9   : > { %v871_v56 = vpop.f32.mrb[2].mxu0 }
 0x1aa   : > { %v2848_v57 = vpop.f32.mrb[3].mxu0 }
 0x1b5   : > { %v1099_v58 = vpop.f32.mrb[4].mxu1 }
 0x1b6   : > { %v1100_v59 = vadd.f32 %v1099_v58, %v1029_v52  ;;  %v2893_v60 = vpop.f32.mrb[5].mxu1  ;;  %v2685_v52 = vld [vmem:[%s3968_s7 + $0x60] sm:$0xff] }
 0x1b7   : > { %v3115_v54 = vpack.c.bf16 %v2686_v53, %v2685_v52 }
 0x1b8   : > { %v1110_v8 = vadd.f32 %v2648_v6, %v1100_v59  ;;  %v2694_v6 = vld [vmem:[%s3970_s9 + $0x1] ss:$0 sm:$0xff] }
 0x1b9   : > { %v941_v61 = vpop.f32.mrb[4].mxu0  ;;  %v1518_v63 = vpop.f32.mrb[6].mxu1 }
 0x1ba   : > { %v942_v1 = vadd.f32 %v941_v61, %v871_v56  ;;  %v2867_v2 = vpop.f32.mrb[5].mxu0  ;;  %v2936_v3 = vpop.f32.mrb[7].mxu1 }
 0x1bc   : > { %v952_v5 = vadd.f32 %v2645_v62, %v942_v1  ;;  %v2666_v62 = vld [vmem:[%s3999_s3 + $0x1] ss:$0 sm:$0xff]  ;;  %s3201_s3 = scalar_lea.vmem %s3200_s2, 128 }
 0x1be   : > { %2895 = vmatpush3.xpose.msk.msra.mxu0 %vm639_vm5, %v952_v5 }
 0x1bf   : > { %2899 = vmatprep.subr.mxu0 %v3321_v35 }
 0x1c1   : > { %2897 = vmatmul.mubr.msk.f32.vlgmr.msra.gmra.mrb[6].mxu0 %vm639_vm5, %v794_v7 }
 0x1c2   : > { %2900 = vmatpush3.msk.msra.mxu0 %vm1201_vm7, %v1110_v8  ;;  %2901 = vmatprep.mubr.msk.f32.mxu0 %vm3320_vm1, %v3321_v35 }
 0x1c3   : > { %3075 = vmatprep.subr.bf16.mxu0 %v3319_v18 }
 0x1c9   : > { %v1588_v9 = vpop.f32.mrb[8].mxu1 }
 0x1ca   : > { %v1589_v11 = vadd.f32 %v1588_v9, %v1518_v63  ;;  %v2955_v12 = vpop.f32.mrb[9].mxu1 }
 0x1cc   : > { %v1600_v13 = vadd.f32 %v2680_v10, %v1589_v11 }
 0x1ce   : > { %2983 = vmatpush3.xpose.msk.msra.mxu1 %vm639_vm5, %v1600_v13 }
 0x1cf   : > { %2987 = vmatprep.subr.mxu1 %v3321_v35 }
 0x294   : > { %v1183_v15 = vpop.f32.mrb[6].mxu0 }
 0x295   : > { %v2898_v16 = vpop.f32.mrb[7].mxu0  ;;  %v1187_v17 = vsel %vm535_vm0, %v1183_v15, -inf }
 0x296   : > { %1188 = vmax.xlane.f32.xlu0 %v1187_v17 }
 0x323   : > { %v1189_v19 = vpop.xlane.xlu0 %1188 }
 0x324   : > { %v1190_v20 = vsub.f32 %v1183_v15, %v1189_v19 }
 0x326   : > { %v1191_v21 = vmul.f32 1.442695, %v1190_v20  ;;  %v2703_v20 = vld [vmem:[%s3972_s11 + $0x10] sm:$0xff] }
 0x328   : > { %3187 = vpow2.f32 %v1191_v21  ;;  %v2704_v21 = vld [vmem:[%s3972_s11 + $0x18] sm:$0xff] }
 0x332   : > { %v3188_v22 = vpop.eup %3187 }
 0x333   : > { %v1193_v23 = vsel %vm535_vm0, %v3188_v22, 0.0 }
 0x334   : > { %1194 = vadd.xlane.f32.xlu1 %v1193_v23 }
 0x3c1   : > { %v1195_v24 = vpop.xlane.xlu1 %1194 }
 0x3c2   : > { %3189 = vrcp.f32 %v1195_v24  ;;  %v2699_v24 = vld [vmem:[%s3971_s10 + $0x10] sm:$0xff] }
 0x3cc   : > { %v3190_v27 = vpop.eup %3189 }
 0x3cd   : > { %v1197_v29 = vmul.f32 %v3190_v27, %v3188_v22  ;;  %v3127_v22 = vpack.c.bf16 %v2704_v21, %v2703_v20  ;;  %v3121_v27 = vpack.c.bf16 %v2700_v25, %v2699_v24 }
 0x3cf   : > { %2902 = vmatmul.mubr.msk.f32.vlgmr.msra.gmra.mrb[8].mxu0 %vm605_vm6, %v1197_v29  ;;  %v1275_v29 = vld [vmem:[%s3971_s10] sm:$0xff] }
 0x3d0   : > { %3077 = vmatpush3.bf16.msra.mxu0 %v3076_v28  ;;  %2908 = vmatprep.mubr.msk.f32.mxu0 %vm3320_vm1, %v3321_v35  ;;  %v3124_v31 = vpack.c.bf16 %v1276_v30, %v1275_v29 }
 0x3d1   : > { %3078 = vmatprep.subr.bf16.mxu0 %v3319_v18 }
 0x3d3   : > { %2909 = vmatmul.mubr.msk.f32.vlgmr.msra.gmra.mrb[10].mxu0 %vm639_vm5, %v3563_v14 }
 0x3d4   : > { %3080 = vmatpush3.bf16.msra.mxu0 %v3079_v32  ;;  %2927 = vmatprep.mubr.msk.f32.mxu0 %vm3320_vm1, %v3321_v35  ;;  %v1277_v32 = vld [vmem:[%s3972_s11] sm:$0xff] }
 0x3d5   : > { %3081 = vmatprep.subr.bf16.mxu0 %v3319_v18  ;;  %v3130_v37 = vpack.c.bf16 %v1278_v33, %v1277_v32 }
 0x3d8   : > { %3083 = vmatpush3.bf16.msra.mxu0 %v3082_v36 }
 0x3d9   : > { %3084 = vmatprep.subr.bf16.mxu0 %v3319_v18 }
 0x3dc   : > { %3086 = vmatpush3.bf16.msra.mxu0 %v3085_v39 }
 0x3dd   : > { %3087 = vmatprep.subr.bf16.mxu0 %v3319_v18 }
 0x3e0   : > { %3089 = vmatpush3.bf16.msra.mxu0 %v3088_v42 }
 0x3e1   : > { %3105 = vmatprep.subr.bf16.mxu0 %v3319_v18 }
 0x3e3   : > { %2928 = vmatmul.mubr.msk.f32.vlgmr.msra.gmra.mrb[12].mxu0 %vm713_vm2, %v3467_v0 }
 0x3e4   : > { %3107 = vmatpush3.bf16.msra.mxu0 %v3106_v45  ;;  %2960 = vmatprep.mubr.msk.f32.mxu0 %vm3320_vm1, %v3321_v35 }
 0x3e5   : > { %3108 = vmatprep.subr.bf16.mxu0 %v3319_v18 }
 0x3e7   : > { %2961 = vmatmul.mubr.msk.f32.vlgmr.msra.gmra.mrb[14].mxu0 %vm639_vm5, %v3563_v14  ;;  %v2687_v14 = vld [vmem:[%s3968_s7 + $0x70] sm:$0xff] }
 0x3e8   : > { %3110 = vmatpush3.bf16.msra.mxu0 %v3109_v48  ;;  %2979 = vmatprep.mubr.msk.f32.mxu0 %vm3320_vm1, %v3321_v35  ;;  %v3118_v56 = vpack.c.bf16 %v2688_v55, %v2687_v14 }
 0x3e9   : > { %3111 = vmatprep.subr.bf16.mxu0 %v3319_v18 }
 0x3ec   : > { %3113 = vmatpush3.bf16.msra.mxu0 %v3112_v51 }
 0x3ed   : > { %3114 = vmatprep.subr.bf16.mxu0 %v3319_v18 }
 0x3f0   : > { %3116 = vmatpush3.bf16.msra.mxu0 %v3115_v54 }
 0x3f1   : > { %3117 = vmatprep.subr.bf16.mxu0 %v3319_v18 }
 0x3f4   : > { %3119 = vmatpush3.bf16.msra.mxu0 %v3118_v56 }
 0x3f5   : > { %3126 = vmatprep.subr.bf16.mxu0 %v3319_v18 }
 0x3f7   : > { %2980 = vmatmul.mubr.msk.f32.vlgmr.msra.gmra.mrb[16].mxu0 %vm713_vm2, %v3467_v0 }
 0x3f8   : > { %3010 = vmatprep.mubr.msk.f32.mxu0 %vm3320_vm1, %v3321_v35  ;;  %3128 = vmatpush3.bf16.msra.mxu0 %v3127_v22 }
 0x3f9   : > { %3020 = vmatprep.subr.mxu0 %v3321_v35 }
 0x4a2   : > { %v3779_v57 = vpop.f32.mrb[8].mxu0 }
 0x4a3   : > { %v2903_v58 = vpop.f32.mrb[9].mxu0 }
 0x4a6   : > { %v1357_v59 = vpop.f32.mrb[10].mxu0 }
 0x4a7   : > { %v2910_v60 = vpop.f32.mrb[11].mxu0 }
 0x4b6   : > { %v1427_v61 = vpop.f32.mrb[12].mxu0 }
 0x4b7   : > { %v1428_v63 = vadd.f32 %v1427_v61, %v1357_v59  ;;  %v2929_v1 = vpop.f32.mrb[13].mxu0  ;;  %v3323_v59 = vmov 0  }
 0x4b9   : > { %v1439_v2 = vadd.f32 %v2666_v62, %v1428_v63 }
 0x4ba   : > { %v1679_v3 = vpop.f32.mrb[14].mxu0 }
 0x4bb   : > { %v2962_v4 = vpop.f32.mrb[15].mxu0  ;;  %2985 = vmatmul.mubr.msk.f32.vlgmr.msra.gmra.mrb[10].mxu1 %vm639_vm5, %v1439_v2 }
 0x4bc   : > { %2989 = vmatprep.mubr.msk.f32.mxu1 %vm3320_vm1, %v3321_v35 }
 0x4ca   : > { %v1749_v5 = vpop.f32.mrb[16].mxu0 }
 0x4cb   : > { %v1750_v7 = vadd.f32 %v1749_v5, %v1679_v3  ;;  %v2981_v8 = vpop.f32.mrb[17].mxu0 }
 0x4cd   : > { %v1761_v9 = vadd.f32 %v2694_v6, %v1750_v7 }
 0x4cf   : > { %2988 = vmatpush3.msk.msra.mxu1 %vm1201_vm7, %v1761_v9 }
 0x4d0   : > { %3120 = vmatprep.subr.bf16.mxu1 %v3319_v18 }
 0x58e   : > { %v1834_v10 = vpop.f32.mrb[10].mxu1 }
 0x58f   : > { %v2986_v11 = vpop.f32.mrb[11].mxu1  ;;  %v1838_v12 = vsel %vm535_vm0, %v1834_v10, -inf }
 0x590   : > { %1839 = vmax.xlane.f32.xlu0 %v1838_v12 }
 0x61d   : > { %v1840_v13 = vpop.xlane.xlu0 %1839 }
 0x61e   : > { %v1841_v15 = vsub.f32 %v1834_v10, %v1840_v13 }
 0x620   : > { %v1842_v16 = vmul.f32 1.442695, %v1841_v15 }
 0x622   : > { %3191 = vpow2.f32 %v1842_v16 }
 0x62c   : > { %v3192_v17 = vpop.eup %3191 }
 0x62d   : > { %v1844_v19 = vsel %vm535_vm0, %v3192_v17, 0.0  ;;  %vm2233_vm0 = vcmask 60416  }
 0x62e   : > { %1845 = vadd.xlane.f32.xlu1 %v1844_v19 }
 0x6bb   : > { %v1846_v23 = vpop.xlane.xlu1 %1845 }
 0x6bc   : > { %3193 = vrcp.f32 %v1846_v23 }
 0x6c6   : > { %v3194_v26 = vpop.eup %3193 }
 0x6c7   : > { %v1848_v28 = vmul.f32 %v3194_v26, %v3192_v17 }
 0x6c9   : > { %2990 = vmatmul.mubr.msk.f32.vlgmr.msra.gmra.mrb[12].mxu1 %vm605_vm6, %v1848_v28 }
 0x6ca   : > { %3122 = vmatpush3.bf16.msra.mxu1 %v3121_v27  ;;  %2996 = vmatprep.mubr.msk.f32.mxu1 %vm3320_vm1, %v3321_v35 }
 0x6cb   : > { %3123 = vmatprep.subr.bf16.mxu1 %v3319_v18 }
 0x79c   : > { %v1921_v34 = vpop.f32.mrb[12].mxu1 }
 0x79d   : > { %v2991_v36 = vpop.f32.mrb[13].mxu1  ;;  %2997 = vmatmul.mubr.msk.f32.vlgmr.msra.gmra.mrb[14].mxu1 %vm639_vm5, %v1921_v34  ;;  %3011 = vmatmul.mubr.msk.f32.vlgmr.msra.gmra.mrb[18].mxu0 %vm639_vm5, %v1921_v34 }
 0x79e   : > { %3125 = vmatpush3.bf16.msra.mxu1 %v3124_v31  ;;  %3003 = vmatprep.mubr.msk.f32.mxu1 %vm3320_vm1, %v3321_v35 }
 0x79f   : > { %3129 = vmatprep.subr.bf16.mxu1 %v3319_v18  ;;  %3022 = vmatprep.mubr.msk.f32.mxu0 %vm3320_vm1, %v3321_v35  ;;  %v3322_v18 = vmov 1.0  }
 0x7a0   : > { %3021 = vmatpush3.msk.msra.mxu0 %vm1201_vm7, %v3322_v18 }
 0x7a1   : > { %3004 = vmatmul.mubr.msk.f32.vlgmr.msra.gmra.mrb[16].mxu1 %vm639_vm5, %v3779_v57 }
 0x7a2   : > { %3131 = vmatpush3.bf16.msra.mxu1 %v3130_v37  ;;  %3017 = vmatprep.mubr.msk.f32.mxu1 %vm3320_vm1, %v3321_v35 }
 0x7a3   : > { %3025 = vmatprep.subr.mxu1 %v3321_v35 }
 0x7a5   : > { %3018 = vmatmul.mubr.msk.f32.vlgmr.msra.gmra.mrb[18].mxu1 %vm639_vm5, %v3779_v57 }
 0x7a6   : > { %3026 = vmatpush3.msk.msra.mxu1 %vm1201_vm7, %v3467_v0  ;;  %3027 = vmatprep.mubr.msk.f32.mxu1 %vm3320_vm1, %v3321_v35  ;;  %vm2244_vm1 = vcmask 57344  }
 0x870   : > { %v1997_v38 = vpop.f32.mrb[14].mxu1  ;;  %v2143_v39 = vpop.f32.mrb[18].mxu0 }
 0x871   : > { %v2998_v40 = vpop.f32.mrb[15].mxu1  ;;  %v3012_v41 = vpop.f32.mrb[19].mxu0 }
 0x874   : > { %v2070_v42 = vpop.f32.mrb[16].mxu1 }
 0x875   : > { %v2071_v0 = vadd.f32 %v2070_v42, %v1997_v38  ;;  %v3005_v44 = vpop.f32.mrb[17].mxu1 }
 0x877   : > { %v2224_v35 = vadd.f32 %v2707_v43, %v2071_v0 }
 0x878   : > { %v2213_v45 = vpop.f32.mrb[18].mxu1 }
 0x879   : > { %v2214_v47 = vadd.f32 %v2213_v45, %v2143_v39  ;;  %2360 = vxpose.xlu1.b32.start.end [1/1] (short) (narrow) %v2224_v35, 8  ;;  %v3019_v48 = vpop.f32.mrb[19].mxu1  ;;  %2243 = vst.msk [vmem:[%s3852_s27] sm:$0xf] %vm2233_vm0, %v2224_v35 }
 0x87b   : > { %v2232_v49 = vadd.f32 %v2708_v46, %v2214_v47 }
 0x87d   : > { %2246 = vxpose.xlu0.b32.start.end [1/1] (short) (narrow) %v2232_v49, 8  ;;  %v2234_v50 = vsel %vm2233_vm0, %v2232_v49, 0.0 }
 0x87e   : > { %v2235_v51 = vrot.slane %v2234_v50, 4 }
 0x880   : > { %v2236_v52 = vadd.f32 %v2235_v51, %v2234_v50 }
 0x882   : > { %v2237_v53 = vrot.slane %v2236_v52, 2 }
 0x884   : > { %v2238_v54 = vadd.f32 %v2237_v53, %v2236_v52 }
 0x886   : > { %v2239_v14 = vrot.slane %v2238_v54, 1 }
 0x888   : > { %v2240_v55 = vadd.f32 %v2239_v14, %v2238_v54 }
 0x88a   : > { %v2242_v56 = vmul.f32 0.25, %v2240_v55 }
 0x88c   : > { %2245 = vst.msk [vmem:[%s3983_s17] sm:$0x1] %vm2244_vm1, %v2242_v56  ;;  %s3195_s17 = scalar_lea.vmem %s2505_s28, 64 }
 0x88d   : > { %p3196_p11 = scmp.ne.s32.totalorder %s2505_s28, %s3195_s17  ;;  %p3203_p1 = scmp.lt.s32.totalorder %s3201_s3, %s3195_s17 }
 0x88f   : > { %p3197_p12 = pnand %p3196_p11, %p3452_p5  ;;  %p3204_p2 = por %p3203_p1, %p3202_p0 }
 0x891   : > { %p3198_p13 = pneg %p3197_p12 }
 0x893   : > { %p3205_p3 = pnand %p3204_p2, %p3198_p13 }
 0x8a6   : > { %3186 = vset.pattern.permute.xlu0 %v3323_v59 }
 0x8f9   : > { %v2376_v57 = vpop.trf.xlu1 }
 0x8fa   : > { %3028 = vmatmul.mubr.msk.f32.vlgmr.msra.gmra.mrb[20].mxu1 %vm605_vm6, %v2376_v57 }
 0x8fd   : > { %v2262_v58 = vpop.trf.xlu0 }
 0x8fe   : > { %3023 = vmatmul.mubr.msk.f32.vlgmr.msra.gmra.mrb[20].mxu0 %vm605_vm6, %v2262_v58 }
 0x9cd   : > { %v3860_v60 = vpop.f32.mrb[20].mxu1 }
 0x9ce   : > { %v3029_v61 = vpop.f32.mrb[21].mxu1 }
 0x9d1   : > { %v2350_v62 = vpop.f32.mrb[20].mxu0 }
 0x9d2   : > { %v2354_v63 = vmul.f32 0.25, %v2350_v62  ;;  %v3024_v1 = vpop.f32.mrb[21].mxu0 }
 0x9d4   : > { %2357 = vperm.xlu0 %3186, %v2354_v63  }
 0x9d5   : > { %3208 = shalt.err (!%p3205_p3)
}
 0x9d6   : > { %s3209_s27 = scalar_lea.hbm %s3867_s30, 64  ;;  %s3213_s1 = scalar_lea.hbm %s3976_s15, 128 }
 0x9d7   : > { %p3210_p4 = scmp.ne.s32.totalorder %s3867_s30, %s3209_s27  ;;  %p3214_p9 = scmp.lt.u32.totalorder %s3867_s30, %s3976_s15 }
 0x9d8   : > { %p3215_p10 = scmp.lt.u32.totalorder %s3213_s1, %s3209_s27  ;;  %p3217_p12 = scmp.lt.u32.totalorder %s3209_s27, %s3867_s30 }
 0x9d9   : > { %p3211_p7 = pnand %p3210_p4, %p3452_p5 }
 0x9da   : > { %p3216_p11 = por %p3215_p10, %p3214_p9 }
 0x9db   : > { %p3212_p8 = pneg %p3211_p7 }
 0x9dc   : > { %p3218_p13 = por %p3217_p12, %p3216_p11 }
 0x9de   : > { %p3219_p0 = pnand %p3218_p13, %p3212_p8 }
 0x9e0   : > { %3222 = shalt.err (!%p3219_p0)
}
 0x9e1   : > { %3133 = dma.vmem_to_hbm [thread:$0]  (%p3452_p5), %s2505_s28, 64, %s3867_s30, %s3870_s29  }
 0x9e2   : > { %s2717_s3 = sshll.u32 %s3433_s25, 4  ;;  %s4000_s17 = scalar_lea.vmem [#allocation6], %s3843_s19 }
 0x9e3   : > { %s2517_s23 = sshll.u32 %s4000_s17, 4  ;;  %s2515_s1 = scalar_lea.hbm %s3977_s16, %s2717_s3  ;;  %s2518_s23 = int_to_ptr.vmem [resolvable:$true] %s2517_s23 }
 0x9e4   : > { %s3223_s27 = scalar_lea.vmem %s2518_s23, 16  ;;  %s3325_s20 = smov [#allocation6]  }
 0x9e5   : > { %p3224_p1 = scmp.ne.s32.totalorder %s2518_s23, %s3223_s27  ;;  %s3227_s2 = sshll.u32 %s3325_s20, 4  ;;  %s3228_s2 = int_to_ptr.vmem [resolvable:$false] %s3227_s2 }
 0x9e6   : > { %s3229_s4 = scalar_lea.vmem %s3228_s2, 32  ;;  %p3230_p4 = scmp.lt.s32.totalorder %s2518_s23, %s3228_s2 }
 0x9e7   : > { %p3225_p2 = pnand %p3224_p1, %p3452_p5  ;;  %p3231_p7 = scmp.lt.s32.totalorder %s3229_s4, %s3223_s27 }
 0x9e9   : > { %p3226_p3 = pneg %p3225_p2  ;;  %p3232_p8 = por %p3231_p7, %p3230_p4 }
 0x9eb   : > { %p3233_p9 = pnand %p3232_p8, %p3226_p3 }
 0x9ed   : > { %3236 = shalt.err (!%p3233_p9)
}
 0x9ee   : > { %s3237_s30 = scalar_lea.hbm %s2515_s1, 16  ;;  %s3241_s17 = scalar_lea.hbm %s3977_s16, 32 }
 0x9ef   : > { %p3238_p10 = scmp.ne.s32.totalorder %s2515_s1, %s3237_s30  ;;  %p3242_p13 = scmp.lt.u32.totalorder %s2515_s1, %s3977_s16 }
 0x9f0   : > { %p3243_p0 = scmp.lt.u32.totalorder %s3241_s17, %s3237_s30  ;;  %p3245_p2 = scmp.lt.u32.totalorder %s3237_s30, %s2515_s1 }
 0x9f1   : > { %p3239_p11 = pnand %p3238_p10, %p3452_p5 }
 0x9f2   : > { %p3244_p1 = por %p3243_p0, %p3242_p13 }
 0x9f3   : > { %p3240_p12 = pneg %p3239_p11 }
 0x9f4   : > { %p3246_p4 = por %p3245_p2, %p3244_p1 }
 0x9f6   : > { %p3247_p3 = pnand %p3246_p4, %p3240_p12 }
 0x9f8   : > { %3250 = shalt.err (!%p3247_p3)
}
 0x9f9   : > { %3134 = dma.vmem_to_hbm [thread:$0]  (%p3452_p5), %s2518_s23, 16, %s2515_s1, %s3870_s29  }
 0x9fa   : > { %s2637_s4 = sshll.u32 %s3843_s19, 3  ;;  %s2715_s27 = sshll.u32 %s3433_s25, 7 }
 0x9fb   : > { %s516_s20 = scalar_lea.vmem [#allocation2], %s2637_s4  ;;  %s3915_s3 = scalar_lea.hbm %s3975_s14, %s2715_s27 }
 0x9fc   : > { %s2491_s2 = sshll.u32 %s516_s20, 4  ;;  %s2469_s29 = scalar_lea.sflag [#allocation3], %s3843_s19  ;;  %s3917_s2 = int_to_ptr.vmem [resolvable:$true] %s2491_s2 }
 0x9fd   : > { %s3251_s23 = scalar_lea.vmem %s3917_s2, 128  ;;  %s3326_s25 = smov [#allocation2]  }
 0x9fe   : > { %p3252_p7 = scmp.ne.s32.totalorder %s3917_s2, %s3251_s23  ;;  %s3255_s1 = sshll.u32 %s3326_s25, 4  ;;  %s3256_s1 = int_to_ptr.vmem [resolvable:$false] %s3255_s1 }
 0x9ff   : > { %s3257_s17 = scalar_lea.vmem %s3256_s1, 256  ;;  %p3258_p10 = scmp.lt.s32.totalorder %s3917_s2, %s3256_s1 }
 0xa00   : > { %p3253_p8 = pnand %p3252_p7, %p3452_p5  ;;  %p3259_p11 = scmp.lt.s32.totalorder %s3257_s17, %s3251_s23 }
 0xa02   : > { %p3254_p9 = pneg %p3253_p8  ;;  %p3260_p12 = por %p3259_p11, %p3258_p10 }
 0xa04   : > { %p3261_p13 = pnand %p3260_p12, %p3254_p9 }
 0xa53   : > { %v2358_v2 = vpop.permute.xlu0 %2357 }
 0xa54   : > { %v2464_v3 = vadd.f32 %v3860_v60, %v2358_v2 }
 0xa56   : > { %2467 = vst.msk [vmem:[%s516_s20] sm:$0xff] %vm713_vm2, %v2464_v3 }
 0xa57   : > { %3264 = shalt.err (!%p3261_p13)
}
 0xa58   : > { %s3265_s19 = scalar_lea.hbm %s3915_s3, 128  ;;  %s3269_s4 = scalar_lea.hbm %s3975_s14, 256 }
 0xa59   : > { %p3266_p0 = scmp.ne.s32.totalorder %s3915_s3, %s3265_s19  ;;  %p3270_p4 = scmp.lt.u32.totalorder %s3915_s3, %s3975_s14 }
 0xa5a   : > { %p3271_p3 = scmp.lt.u32.totalorder %s3269_s4, %s3265_s19  ;;  %p3273_p8 = scmp.lt.u32.totalorder %s3265_s19, %s3915_s3 }
 0xa5b   : > { %p3267_p1 = pnand %p3266_p0, %p3452_p5 }
 0xa5c   : > { %p3272_p7 = por %p3271_p3, %p3270_p4 }
 0xa5d   : > { %p3268_p2 = pneg %p3267_p1 }
 0xa5e   : > { %p3274_p9 = por %p3273_p8, %p3272_p7 }
 0xa60   : > { %p3275_p10 = pnand %p3274_p9, %p3268_p2 }
 0xa62   : > { %3278 = shalt.err (!%p3275_p10)
}
 0xa63   : > { %3132 = dma.vmem_to_hbm [thread:$0]  (%p3452_p5), %s3917_s2, 128, %s3915_s3, %s2469_s29  }
 0xa64 PF: > { %p3148_p11 = scmp.ge.s32.totalorder %s3317_s24, 2  ;;  %s2529_s30 = sand.u32 1, %s3305_s21  }
 0xa65   : > { %s2530_s23 = scalar_lea.sflag [#allocation3], %s2529_s30 }
 0xa66   : > { %p3139_p12 = pnand %p3148_p11, %p3456_p6 }
 0xa68   : > { %3296 = dma.done.wait (!%p3139_p12), %s2530_s23, 128  }
 0xa69   : > { %3298 = vsyncadd (!%p3139_p12), %s2530_s23, 4294967168  ;;  %s4002_s25 = sadd.s32 4294967294, %s3317_s24  }
 0xa6a   : > { %s2538_s1 = sand.u32 1, %s4002_s25  }
 0xa6b   : > { %s2539_s17 = scalar_lea.sflag [#allocation5], %s2538_s1 }
 0xa6c   : > { %3300 = dma.done.wait (!%p3139_p12), %s2539_s17, 80  }
 0xa6d   : > { %3302 = vsyncadd (!%p3139_p12), %s2539_s17, 4294967216  ;;  %s4003_s24 = sld [smem:[#allocation10_spill]]  ;;  %s4004_s0 = sld [smem:[#allocation9_spill]] }
 0xa6e   : > { %s4005_s23 = sld [smem:[#allocation11_spill]]  ;;  %s4006_s21 = smov %s3309_s22 }
 0xa73   : > { %p30_p5 = scmp.ge.s32.totalorder %s4003_s24, 4   ;;  %s4007_s22 = smov %s4004_s0 }
 0xa75   :  { %32 = sbr.rel (!%p30_p5) target bundleno = 11 (0xb), region = 154 }
 0xa7c   :  { %2552 = vsyncpa [#allocation3], 1 }
 0xa7d   :  { %2554 = vsyncpa [#allocation3 + $0x1], 1 }
 0xa7e   :  { %2555 = vsyncpa [#allocation5], 1 }
 0xa7f   :  { %2557 = vsyncpa [#allocation5 + $0x1], 1 }

</bundles_post_ra>
